<compile_context>
chip_gen: v5e
topology: v5e:2x2
jax: 0.10.0
libtpu: 0.0.40
codegen_flags: <defaults>
</compile_context>

<pallas_src>
import functools

import jax
import jax.numpy as jnp
from jax import lax
from jax.experimental import pallas as pl
from jax.experimental.pallas import tpu as pltpu


def _round_up(v, m):
    return (v + m - 1) // m * m


def _block_vmem_bytes(shape, itemsize=4):
    """Bytes one VMEM buffer of this block occupies (last two dims padded to (8,128))."""
    pad = list(shape)
    pad[-1] = _round_up(pad[-1], 128)
    pad[-2] = _round_up(pad[-2], 8)
    n = 1
    for d in pad:
        n *= d
    return n * itemsize


# ----------------------------------------------------------------------------
# Pass A: gathered[e, :] = x_scaled[src[e], :]
# grid = (edge_chunks [parallel], src_node_tiles [reduction])
# ----------------------------------------------------------------------------
def gather_kernel(src_ref, x_ref, g_ref):
    j = pl.program_id(1)                       # source-node tile (reduction axis)

    @pl.when(j == 0)
    def _():
        g_ref[...] = jnp.zeros_like(g_ref)

    st_tile = x_ref.shape[0]
    base = pl.multiple_of(j * st_tile, st_tile)
    node_row = base + lax.broadcasted_iota(jnp.int32, (1, st_tile), 1)    # (1, ST)
    # Padded edges carry src = -1 -> all-zero one-hot rows.
    st = (src_ref[...] == node_row).astype(jnp.float32)                   # (Ec, ST)
    g_ref[...] += jnp.dot(st, x_ref[...], preferred_element_type=jnp.float32)


# ----------------------------------------------------------------------------
# Pass B: out[n, :] = relu(dis[n] * sum_{e: tgt[e] == n} gathered[e, :])
# grid = (node_tiles [parallel], edge_chunks [reduction])
# ----------------------------------------------------------------------------
def scatter_kernel(tgt_ref, dis_ref, g_ref, out_ref):
    i = pl.program_id(0)
    c = pl.program_id(1)
    nt = out_ref.shape[0]

    @pl.when(c == 0)
    def _():
        out_ref[...] = jnp.zeros_like(out_ref)

    base = pl.multiple_of(i * nt, nt)
    node_col = base + lax.broadcasted_iota(jnp.int32, (nt, 1), 0)         # (NT, 1)
    # Padded edges carry tgt = -1 -> all-zero one-hot columns.
    tt = (node_col == tgt_ref[...]).astype(jnp.float32)                   # (NT, Ec)
    out_ref[...] += jnp.dot(tt, g_ref[...], preferred_element_type=jnp.float32)

    @pl.when(c == pl.num_programs(1) - 1)
    def _():
        out_ref[...] = jnp.maximum(out_ref[...] * dis_ref[...], 0.0)


# ----------------------------------------------------------------------------
# Wrapper: padding to lane-dense / MXU-friendly shapes + the two pallas_calls.
# ----------------------------------------------------------------------------
@functools.partial(jax.jit, static_argnames=("node_tile", "edge_chunk"))
def gcn_forward(x, edge_index, *, node_tile=256, edge_chunk=512):
    """x: (N, F) float32; edge_index: (2, E) int32 (row0 = src/j, row1 = tgt/i)."""
    N, F = x.shape
    E = edge_index.shape[1]

    n_pad = _round_up(N, node_tile)
    f_pad = _round_up(F, 128)              # lane-dense features
    e_pad = _round_up(E, edge_chunk)

    src = edge_index[0].astype(jnp.int32)
    tgt = edge_index[1].astype(jnp.int32)

    # Degree / deg^{-1/2} / source-side prescaling: O(E) + O(N*F) prep done as
    # plain XLA ops (hoisted out of the kernels per perf review).  Zero-degree
    # nodes are guarded to 0 (PyTorch would propagate inf; identical whenever
    # self-loops are present).
    deg = jax.ops.segment_sum(jnp.ones((E,), jnp.float32), tgt, num_segments=n_pad)
    dis = jnp.where(deg > 0.0, lax.rsqrt(deg), 0.0)                       # (n_pad,)

    x_p = jnp.pad(x.astype(jnp.float32), ((0, n_pad - N), (0, f_pad - F)))
    x_scaled = x_p * dis[:, None]          # dis[src]-side scaling, done once
    dis_col = dis.reshape(n_pad, 1)        # dis[tgt]-side scaling, applied per tile

    # Padded edges use -1 sentinels -> all-zero one-hot rows/cols in kernels.
    src_col = jnp.pad(src, (0, e_pad - E), constant_values=-1).reshape(e_pad, 1)
    tgt_row = jnp.pad(tgt, (0, e_pad - E), constant_values=-1).reshape(1, e_pad)

    n_node_tiles = n_pad // node_tile
    n_edge_chunks = e_pad // edge_chunk

    # VMEM budgets derived from the actual block sizes (v7x has only 64 MiB).
    gather_vmem = 2 * (_block_vmem_bytes((edge_chunk, 1))
                       + _block_vmem_bytes((node_tile, f_pad))
                       + _block_vmem_bytes((edge_chunk, f_pad))) + (2 << 20)
    scatter_vmem = 2 * (_block_vmem_bytes((1, edge_chunk))
                        + _block_vmem_bytes((node_tile, 1))
                        + _block_vmem_bytes((edge_chunk, f_pad))
                        + _block_vmem_bytes((node_tile, f_pad))) + (2 << 20)
    gather_vmem = min(64 << 20, max(16 << 20, gather_vmem))
    scatter_vmem = min(64 << 20, max(16 << 20, scatter_vmem))

    # Pass A: gathered[e, :] = x_scaled[src[e], :] (runs once per edge chunk,
    # independent of the number of output node tiles).
    gathered = pl.pallas_call(
        gather_kernel,
        out_shape=jax.ShapeDtypeStruct((e_pad, f_pad), jnp.float32),
        grid=(n_edge_chunks, n_node_tiles),
        in_specs=[
            pl.BlockSpec((edge_chunk, 1), lambda c, j: (c, 0)),      # src column
            pl.BlockSpec((node_tile, f_pad), lambda c, j: (j, 0)),   # x_scaled tile
        ],
        out_specs=pl.BlockSpec((edge_chunk, f_pad), lambda c, j: (c, 0)),
        compiler_params=pltpu.CompilerParams(
            dimension_semantics=("parallel", "arbitrary"),
            vmem_limit_bytes=gather_vmem),
    )(src_col, x_scaled)

    # Pass B: out = relu(dis_tgt * one_hot(tgt) @ gathered), accumulated
    # directly into the resident output block (no scratch accumulator).
    out_p = pl.pallas_call(
        scatter_kernel,
        out_shape=jax.ShapeDtypeStruct((n_pad, f_pad), jnp.float32),
        grid=(n_node_tiles, n_edge_chunks),
        in_specs=[
            pl.BlockSpec((1, edge_chunk), lambda i, c: (0, c)),      # tgt row (lane-dense)
            pl.BlockSpec((node_tile, 1), lambda i, c: (i, 0)),       # dis tile
            pl.BlockSpec((edge_chunk, f_pad), lambda i, c: (c, 0)),  # gathered chunk
        ],
        out_specs=pl.BlockSpec((node_tile, f_pad), lambda i, c: (i, 0)),
        compiler_params=pltpu.CompilerParams(
            dimension_semantics=("parallel", "arbitrary"),
            vmem_limit_bytes=scatter_vmem),
    )(tgt_row, dis_col, gathered)

    return out_p[:N, :F]


def gcn_reference(x, edge_index):
    """Pure-JAX reference replicating the PyTorch forward."""
    N = x.shape[0]
    src, tgt = edge_index[0], edge_index[1]
    deg = jax.ops.segment_sum(jnp.ones_like(src, dtype=x.dtype), tgt, N)
    dis = deg ** -0.5
    norm = dis[src] * dis[tgt]
    out = jax.ops.segment_sum(norm[:, None] * x[src], tgt, N)
    return jnp.maximum(out, 0.0)


if __name__ == "__main__":
    key = jax.random.PRNGKey(0)
    k_x, k_s, k_t = jax.random.split(key, 3)

    N, F, E_extra = 16, 32, 48          # 16 self-loops + 48 random edges = 64 edges
    x = jax.random.normal(k_x, (N, F), dtype=jnp.float32)

    self_ids = jnp.arange(N, dtype=jnp.int32)
    src_extra = jax.random.randint(k_s, (E_extra,), 0, N, dtype=jnp.int32)
    tgt_extra = jax.random.randint(k_t, (E_extra,), 0, N, dtype=jnp.int32)
    src = jnp.concatenate([self_ids, src_extra])
    tgt = jnp.concatenate([self_ids, tgt_extra])
    edge_index = jnp.stack([src, tgt], axis=0)      # (2, 64) int32

    out = gcn_forward(x, edge_index)
    jax.block_until_ready(out)

    ref = gcn_reference(x, edge_index)
    assert out.shape == (N, F)
    assert jnp.allclose(out, ref, atol=1e-4, rtol=1e-4), "mismatch vs reference"

    print("KERNEL_OK")
</pallas_src>

<mosaic_0001>
module attributes {stable_mosaic.version = 11 : i64} {
  func.func @scatter_kernel(%arg0: i32, %arg1: i32, %arg2: memref<1x512xi32, #tpu.memory_space<vmem>>, %arg3: memref<256x1xf32, #tpu.memory_space<vmem>>, %arg4: memref<512x128xf32, #tpu.memory_space<vmem>>, %arg5: memref<256x128xf32, #tpu.memory_space<vmem>>) attributes {dimension_semantics = [#tpu.dimension_semantics<parallel>, #tpu.dimension_semantics<arbitrary>], iteration_bounds = array<i64: 1, 1>, scalar_prefetch = 0 : i64, scratch_operands = 0 : i64, tpu.core_type = #tpu.core_type<tc>, window_params = [{transform_indices = @transform_0, window_bounds = array<i64: 1, 512>}, {transform_indices = @transform_1, window_bounds = array<i64: 256, 1>}, {transform_indices = @transform_2, window_bounds = array<i64: 512, 128>}, {transform_indices = @transform_3, window_bounds = array<i64: 256, 128>}]} {
    %c0_i32 = arith.constant 0 : i32
    %0 = arith.cmpi eq, %arg1, %c0_i32 : i32
    %1 = arith.extui %0 : i1 to i32
    %c0_i32_0 = arith.constant 0 : i32
    %2 = arith.cmpi ne, %1, %c0_i32_0 : i32
    scf.if %2 {
      %cst_10 = arith.constant 0.000000e+00 : f32
      %22 = vector.broadcast %cst_10 : f32 to vector<256x128xf32>
      %c0_11 = arith.constant 0 : index
      %c0_12 = arith.constant 0 : index
      %23 = vector.load %arg5[%c0_11, %c0_12] : memref<256x128xf32, #tpu.memory_space<vmem>>, vector<256x128xf32>
      tpu.vector_store %arg5[%c0_11, %c0_12], %22 {strides = array<i32>} : memref<256x128xf32, #tpu.memory_space<vmem>>, vector<256x128xf32>,
    } else {
    }
    %c256_i32 = arith.constant 256 : i32
    %3 = arith.muli %arg0, %c256_i32 : i32
    %4 = tpu.assume_multiple %3, 256 : i32
    %5 = tpu.iota {dimensions = array<i32: 0>} : vector<256x1xi32>
    %6 = vector.broadcast %4 : i32 to vector<256x1xi32>
    %7 = arith.addi %6, %5 : vector<256x1xi32>
    %c0 = arith.constant 0 : index
    %c0_1 = arith.constant 0 : index
    %8 = vector.load %arg2[%c0, %c0_1] : memref<1x512xi32, #tpu.memory_space<vmem>>, vector<1x512xi32>
    %9 = vector.broadcast %7 : vector<256x1xi32> to vector<256x512xi32>
    %10 = vector.broadcast %8 : vector<1x512xi32> to vector<256x512xi32>
    %11 = arith.cmpi eq, %9, %10 : vector<256x512xi32>
    %12 = arith.extui %11 : vector<256x512xi1> to vector<256x512xi32>
    %13 = arith.sitofp %12 : vector<256x512xi32> to vector<256x512xf32>
    %c0_2 = arith.constant 0 : index
    %c0_3 = arith.constant 0 : index
    %14 = vector.load %arg5[%c0_2, %c0_3] : memref<256x128xf32, #tpu.memory_space<vmem>>, vector<256x128xf32>
    %c0_4 = arith.constant 0 : index
    %c0_5 = arith.constant 0 : index
    %15 = vector.load %arg4[%c0_4, %c0_5] : memref<512x128xf32, #tpu.memory_space<vmem>>, vector<512x128xf32>
    %cst = arith.constant dense<0.000000e+00> : vector<256x128xf32>
    %16 = tpu.matmul %13, %15, %cst {dimension_numbers = #tpu.dot_dimension_numbers<[1], [0], [0], [1], [0, 0, 1, 1], [], []>} : vector<256x512xf32>, vector<512x128xf32>, vector<256x128xf32> -> vector<256x128xf32>
    %17 = arith.addf %14, %16 : vector<256x128xf32>
    %c0_6 = arith.constant 0 : index
    %c0_7 = arith.constant 0 : index
    %18 = vector.load %arg5[%c0_6, %c0_7] : memref<256x128xf32, #tpu.memory_space<vmem>>, vector<256x128xf32>
    tpu.vector_store %arg5[%c0_6, %c0_7], %17 {strides = array<i32>} : memref<256x128xf32, #tpu.memory_space<vmem>>, vector<256x128xf32>,
    %c0_i32_8 = arith.constant 0 : i32
    %19 = arith.cmpi eq, %arg1, %c0_i32_8 : i32
    %20 = arith.extui %19 : i1 to i32
    %c0_i32_9 = arith.constant 0 : i32
    %21 = arith.cmpi ne, %20, %c0_i32_9 : i32
    scf.if %21 {
      %c0_10 = arith.constant 0 : index
      %c0_11 = arith.constant 0 : index
      %22 = vector.load %arg5[%c0_10, %c0_11] : memref<256x128xf32, #tpu.memory_space<vmem>>, vector<256x128xf32>
      %c0_12 = arith.constant 0 : index
      %c0_13 = arith.constant 0 : index
      %23 = vector.load %arg3[%c0_12, %c0_13] : memref<256x1xf32, #tpu.memory_space<vmem>>, vector<256x1xf32>
      %24 = vector.broadcast %23 : vector<256x1xf32> to vector<256x128xf32>
      %25 = arith.mulf %22, %24 : vector<256x128xf32>
      %cst_14 = arith.constant 0.000000e+00 : f32
      %26 = vector.broadcast %cst_14 : f32 to vector<256x128xf32>
      %27 = arith.maximumf %25, %26 : vector<256x128xf32>
      %c0_15 = arith.constant 0 : index
      %c0_16 = arith.constant 0 : index
      %28 = vector.load %arg5[%c0_15, %c0_16] : memref<256x128xf32, #tpu.memory_space<vmem>>, vector<256x128xf32>
      tpu.vector_store %arg5[%c0_15, %c0_16], %27 {strides = array<i32>} : memref<256x128xf32, #tpu.memory_space<vmem>>, vector<256x128xf32>,
    } else {
    }
    return
  }
  func.func @transform_0(%arg0: i32, %arg1: i32) -> (i32, i32) {
    %c0_i32 = arith.constant 0 : i32
    %c0_i32_0 = arith.constant 0 : i32
    return %c0_i32, %arg1 : i32, i32
  }
  func.func @transform_1(%arg0: i32, %arg1: i32) -> (i32, i32) {
    %c0_i32 = arith.constant 0 : i32
    %c0_i32_0 = arith.constant 0 : i32
    return %arg0, %c0_i32 : i32, i32
  }
  func.func @transform_2(%arg0: i32, %arg1: i32) -> (i32, i32) {
    %c0_i32 = arith.constant 0 : i32
    %c0_i32_0 = arith.constant 0 : i32
    return %arg1, %c0_i32 : i32, i32
  }
  func.func @transform_3(%arg0: i32, %arg1: i32) -> (i32, i32) {
    %c0_i32 = arith.constant 0 : i32
    %c0_i32_0 = arith.constant 0 : i32
    return %arg0, %c0_i32 : i32, i32
  }
}

module attributes {stable_mosaic.version = 11 : i64} {
  func.func @gather_kernel(%arg0: i32, %arg1: i32, %arg2: memref<512x1xi32, #tpu.memory_space<vmem>>, %arg3: memref<256x128xf32, #tpu.memory_space<vmem>>, %arg4: memref<512x128xf32, #tpu.memory_space<vmem>>) attributes {dimension_semantics = [#tpu.dimension_semantics<parallel>, #tpu.dimension_semantics<arbitrary>], iteration_bounds = array<i64: 1, 1>, scalar_prefetch = 0 : i64, scratch_operands = 0 : i64, tpu.core_type = #tpu.core_type<tc>, window_params = [{transform_indices = @transform_0, window_bounds = array<i64: 512, 1>}, {transform_indices = @transform_1, window_bounds = array<i64: 256, 128>}, {transform_indices = @transform_2, window_bounds = array<i64: 512, 128>}]} {
    %c0_i32 = arith.constant 0 : i32
    %0 = arith.cmpi eq, %arg1, %c0_i32 : i32
    %1 = arith.extui %0 : i1 to i32
    %c0_i32_0 = arith.constant 0 : i32
    %2 = arith.cmpi ne, %1, %c0_i32_0 : i32
    scf.if %2 {
      %cst_8 = arith.constant 0.000000e+00 : f32
      %19 = vector.broadcast %cst_8 : f32 to vector<512x128xf32>
      %c0_9 = arith.constant 0 : index
      %c0_10 = arith.constant 0 : index
      %20 = vector.load %arg4[%c0_9, %c0_10] : memref<512x128xf32, #tpu.memory_space<vmem>>, vector<512x128xf32>
      tpu.vector_store %arg4[%c0_9, %c0_10], %19 {strides = array<i32>} : memref<512x128xf32, #tpu.memory_space<vmem>>, vector<512x128xf32>,
    } else {
    }
    %c256_i32 = arith.constant 256 : i32
    %3 = arith.muli %arg1, %c256_i32 : i32
    %4 = tpu.assume_multiple %3, 256 : i32
    %5 = tpu.iota {dimensions = array<i32: 1>} : vector<1x256xi32>
    %6 = vector.broadcast %4 : i32 to vector<1x256xi32>
    %7 = arith.addi %6, %5 : vector<1x256xi32>
    %c0 = arith.constant 0 : index
    %c0_1 = arith.constant 0 : index
    %8 = vector.load %arg2[%c0, %c0_1] : memref<512x1xi32, #tpu.memory_space<vmem>>, vector<512x1xi32>
    %9 = vector.broadcast %8 : vector<512x1xi32> to vector<512x256xi32>
    %10 = vector.broadcast %7 : vector<1x256xi32> to vector<512x256xi32>
    %11 = arith.cmpi eq, %9, %10 : vector<512x256xi32>
    %12 = arith.extui %11 : vector<512x256xi1> to vector<512x256xi32>
    %13 = arith.sitofp %12 : vector<512x256xi32> to vector<512x256xf32>
    %c0_2 = arith.constant 0 : index
    %c0_3 = arith.constant 0 : index
    %14 = vector.load %arg4[%c0_2, %c0_3] : memref<512x128xf32, #tpu.memory_space<vmem>>, vector<512x128xf32>
    %c0_4 = arith.constant 0 : index
    %c0_5 = arith.constant 0 : index
    %15 = vector.load %arg3[%c0_4, %c0_5] : memref<256x128xf32, #tpu.memory_space<vmem>>, vector<256x128xf32>
    %cst = arith.constant dense<0.000000e+00> : vector<512x128xf32>
    %16 = tpu.matmul %13, %15, %cst {dimension_numbers = #tpu.dot_dimension_numbers<[1], [0], [0], [1], [0, 0, 1, 1], [], []>} : vector<512x256xf32>, vector<256x128xf32>, vector<512x128xf32> -> vector<512x128xf32>
    %17 = arith.addf %14, %16 : vector<512x128xf32>
    %c0_6 = arith.constant 0 : index
    %c0_7 = arith.constant 0 : index
    %18 = vector.load %arg4[%c0_6, %c0_7] : memref<512x128xf32, #tpu.memory_space<vmem>>, vector<512x128xf32>
    tpu.vector_store %arg4[%c0_6, %c0_7], %17 {strides = array<i32>} : memref<512x128xf32, #tpu.memory_space<vmem>>, vector<512x128xf32>,
    return
  }
  func.func @transform_0(%arg0: i32, %arg1: i32) -> (i32, i32) {
    %c0_i32 = arith.constant 0 : i32
    %c0_i32_0 = arith.constant 0 : i32
    return %arg0, %c0_i32 : i32, i32
  }
  func.func @transform_1(%arg0: i32, %arg1: i32) -> (i32, i32) {
    %c0_i32 = arith.constant 0 : i32
    %c0_i32_0 = arith.constant 0 : i32
    return %arg1, %c0_i32 : i32, i32
  }
  func.func @transform_2(%arg0: i32, %arg1: i32) -> (i32, i32) {
    %c0_i32 = arith.constant 0 : i32
    %c0_i32_0 = arith.constant 0 : i32
    return %arg0, %c0_i32 : i32, i32
  }
}

</mosaic_0001>

<bundles_post_ra>
// kernel: gcn_forward.3
= control target key start
LH: loop header
LB: loop body
LE: loop exit
PB: predicated region body
PF: predicated region fallthrough
CT: control target
= control target key end

     0   :  { %v51_v48 = vlaneseq  ;;  %s2417_s2 = inlined_call_operand.vmem [shape: f32[512,128], index: 2, kind: input, shape index: {}]   ;;  %s2418_s0 = inlined_call_operand.vmem [shape: s32[1,512], index: 0, kind: input, shape index: {}]   ;;  %s2419_s1 = inlined_call_operand.vmem [shape: f32[256,1], index: 1, kind: input, shape index: {}]   ;;  %s2420_s3 = inlined_call_operand.vmem [shape: f32[256,128], index: 3, kind: output, shape index: {}]  }
   0x1   :  { %v585_v0 = vld [vmem:[%s2417_s2 + $0x178] sm:$0xff]  ;;  %v584_v1 = vld [vmem:[%s2417_s2 + $0x170] sm:$0xff]  ;;  %v583_v5 = vld [vmem:[%s2417_s2 + $0x168] sm:$0xff] }
   0x2   :  { %v601_v2 = vld [vmem:[%s2417_s2 + $0x1f8] sm:$0xff]  ;;  %828 = vmatpush.msra.mxu2 %v585_v0  ;;  %v600_v6 = vld [vmem:[%s2417_s2 + $0x1f0] sm:$0xff]  ;;  %v599_v9 = vld [vmem:[%s2417_s2 + $0x1e8] sm:$0xff]  ;;  %v1900_v58 = vshrl.u32 %v51_v48, 7 }
   0x3   :  { %941 = vmatpush.msra.mxu3 %v601_v2  ;;  %v553_v3 = vld [vmem:[%s2417_s2 + $0x78] sm:$0xff]  ;;  %v552_v7 = vld [vmem:[%s2417_s2 + $0x70] sm:$0xff]  ;;  %v551_v10 = vld [vmem:[%s2417_s2 + $0x68] sm:$0xff] }
   0x4   :  { %v569_v4 = vld [vmem:[%s2417_s2 + $0xf8] sm:$0xff]  ;;  %602 = vmatpush.msra.mxu0 %v553_v3  ;;  %v568_v8 = vld [vmem:[%s2417_s2 + $0xf0] sm:$0xff]  ;;  %829 = vmatpush.msra.mxu2 %v584_v1  ;;  %v582_v11 = vld [vmem:[%s2417_s2 + $0x160] sm:$0xff] }
   0x5   :  { %715 = vmatpush.msra.mxu1 %v569_v4  ;;  %942 = vmatpush.msra.mxu3 %v600_v6  ;;  %v567_v12 = vld [vmem:[%s2417_s2 + $0xe8] sm:$0xff]  ;;  %v598_v13 = vld [vmem:[%s2417_s2 + $0x1e0] sm:$0xff]  ;;  %v581_v16 = vld [vmem:[%s2417_s2 + $0x158] sm:$0xff] }
   0x6   :  { %603 = vmatpush.msra.mxu0 %v552_v7  ;;  %830 = vmatpush.msra.mxu2 %v583_v5  ;;  %v550_v14 = vld [vmem:[%s2417_s2 + $0x60] sm:$0xff]  ;;  %v597_v17 = vld [vmem:[%s2417_s2 + $0x1d8] sm:$0xff]  ;;  %v580_v20 = vld [vmem:[%s2417_s2 + $0x150] sm:$0xff]  ;;  %v1707_v7 = vmov 1.0  }
   0x7   :  { %716 = vmatpush.msra.mxu1 %v568_v8  ;;  %943 = vmatpush.msra.mxu3 %v599_v9  ;;  %v566_v15 = vld [vmem:[%s2417_s2 + $0xe0] sm:$0xff]  ;;  %v549_v18 = vld [vmem:[%s2417_s2 + $0x58] sm:$0xff]  ;;  %v596_v21 = vld [vmem:[%s2417_s2 + $0x1d0] sm:$0xff]  ;;  %v53_v8 = vadd.s32 8, %v1900_v58 }
   0x8   :  { %604 = vmatpush.msra.mxu0 %v551_v10  ;;  %831 = vmatpush.msra.mxu2 %v582_v11  ;;  %v565_v19 = vld [vmem:[%s2417_s2 + $0xd8] sm:$0xff]  ;;  %v548_v22 = vld [vmem:[%s2417_s2 + $0x50] sm:$0xff]  ;;  %v579_v24 = vld [vmem:[%s2417_s2 + $0x148] sm:$0xff]  ;;  %v1708_v10 = vmov 0  }
   0x9   :  { %717 = vmatpush.msra.mxu1 %v567_v12  ;;  %944 = vmatpush.msra.mxu3 %v598_v13  ;;  %v564_v23 = vld [vmem:[%s2417_s2 + $0xd0] sm:$0xff]  ;;  %v595_v25 = vld [vmem:[%s2417_s2 + $0x1c8] sm:$0xff]  ;;  %v578_v28 = vld [vmem:[%s2417_s2 + $0x140] sm:$0xff]  ;;  %v54_v12 = vadd.s32 16, %v1900_v58 }
   0xa   :  { %605 = vmatpush.msra.mxu0 %v550_v14  ;;  %832 = vmatpush.msra.mxu2 %v581_v16  ;;  %v547_v26 = vld [vmem:[%s2417_s2 + $0x48] sm:$0xff]  ;;  %v594_v29 = vld [vmem:[%s2417_s2 + $0x1c0] sm:$0xff]  ;;  %v577_v32 = vld [vmem:[%s2417_s2 + $0x138] sm:$0xff]  ;;  %v56_v16 = vadd.s32 32, %v1900_v58 }
   0xb   :  { %718 = vmatpush.msra.mxu1 %v566_v15  ;;  %945 = vmatpush.msra.mxu3 %v597_v17  ;;  %v563_v27 = vld [vmem:[%s2417_s2 + $0xc8] sm:$0xff]  ;;  %v546_v30 = vld [vmem:[%s2417_s2 + $0x40] sm:$0xff]  ;;  %v593_v33 = vld [vmem:[%s2417_s2 + $0x1b8] sm:$0xff]  ;;  %v55_v15 = vadd.s32 24, %v1900_v58  ;;  %v57_v17 = vadd.s32 40, %v1900_v58 }
   0xc   :  { %606 = vmatpush.msra.mxu0 %v549_v18  ;;  %833 = vmatpush.msra.mxu2 %v580_v20  ;;  %v562_v31 = vld [vmem:[%s2417_s2 + $0xc0] sm:$0xff]  ;;  %v545_v34 = vld [vmem:[%s2417_s2 + $0x38] sm:$0xff]  ;;  %v576_v36 = vld [vmem:[%s2417_s2 + $0x130] sm:$0xff] }
   0xd   :  { %719 = vmatpush.msra.mxu1 %v565_v19  ;;  %946 = vmatpush.msra.mxu3 %v596_v21  ;;  %v561_v35 = vld [vmem:[%s2417_s2 + $0xb8] sm:$0xff]  ;;  %v592_v37 = vld [vmem:[%s2417_s2 + $0x1b0] sm:$0xff]  ;;  %v575_v40 = vld [vmem:[%s2417_s2 + $0x128] sm:$0xff]  ;;  %v58_v19 = vadd.s32 48, %v1900_v58 }
   0xe   :  { %607 = vmatpush.msra.mxu0 %v548_v22  ;;  %834 = vmatpush.msra.mxu2 %v579_v24  ;;  %v544_v38 = vld [vmem:[%s2417_s2 + $0x30] sm:$0xff]  ;;  %v591_v41 = vld [vmem:[%s2417_s2 + $0x1a8] sm:$0xff]  ;;  %v574_v44 = vld [vmem:[%s2417_s2 + $0x120] sm:$0xff]  ;;  %v59_v22 = vadd.s32 56, %v1900_v58  ;;  %v60_v24 = vadd.s32 64, %v1900_v58 }
   0xf   :  { %720 = vmatpush.msra.mxu1 %v564_v23  ;;  %947 = vmatpush.msra.mxu3 %v595_v25  ;;  %v560_v39 = vld [vmem:[%s2417_s2 + $0xb0] sm:$0xff]  ;;  %v543_v42 = vld [vmem:[%s2417_s2 + $0x28] sm:$0xff]  ;;  %v590_v45 = vld [vmem:[%s2417_s2 + $0x1a0] sm:$0xff] }
  0x10   :  { %608 = vmatpush.msra.mxu0 %v547_v26  ;;  %835 = vmatpush.msra.mxu2 %v578_v28  ;;  %v559_v43 = vld [vmem:[%s2417_s2 + $0xa8] sm:$0xff]  ;;  %v542_v46 = vld [vmem:[%s2417_s2 + $0x20] sm:$0xff]  ;;  %v573_v49 = vld [vmem:[%s2417_s2 + $0x118] sm:$0xff]  ;;  %v61_v26 = vadd.s32 72, %v1900_v58  ;;  %v62_v28 = vadd.s32 80, %v1900_v58 }
  0x11   :  { %721 = vmatpush.msra.mxu1 %v563_v27  ;;  %948 = vmatpush.msra.mxu3 %v594_v29  ;;  %v558_v47 = vld [vmem:[%s2417_s2 + $0xa0] sm:$0xff]  ;;  %v589_v50 = vld [vmem:[%s2417_s2 + $0x198] sm:$0xff]  ;;  %v572_v54 = vld [vmem:[%s2417_s2 + $0x110] sm:$0xff] }
  0x12   :  { %609 = vmatpush.msra.mxu0 %v546_v30  ;;  %836 = vmatpush.msra.mxu2 %v577_v32  ;;  %v117_v51 = vld [vmem:[%s2418_s0] sm:$0xf]  ;;  %v541_v52 = vld [vmem:[%s2417_s2 + $0x18] sm:$0xff]  ;;  %v588_v55 = vld [vmem:[%s2417_s2 + $0x190] sm:$0xff]  ;;  %v63_v30 = vadd.s32 88, %v1900_v58  ;;  %v64_v32 = vadd.s32 96, %v1900_v58 }
  0x13   :  { %722 = vmatpush.msra.mxu1 %v562_v31  ;;  %949 = vmatpush.msra.mxu3 %v593_v33  ;;  %v557_v53 = vld [vmem:[%s2417_s2 + $0x98] sm:$0xff]  ;;  %v540_v56 = vld [vmem:[%s2417_s2 + $0x10] sm:$0xff]  ;;  %v1902_v59 = vperm.slane %v117_v51, 2  ;;  %v1904_v60 = vperm.slane %v117_v51, 3  ;;  %v571_v61 = vld [vmem:[%s2417_s2 + $0x108] sm:$0xff]  ;;  %v1918_v1 = vperm.slane %v117_v51, 0 }
  0x14   :  { %610 = vmatpush.msra.mxu0 %v545_v34  ;;  %837 = vmatpush.msra.mxu2 %v576_v36  ;;  %v556_v57 = vld [vmem:[%s2417_s2 + $0x90] sm:$0xff]  ;;  %v587_v62 = vld [vmem:[%s2417_s2 + $0x188] sm:$0xff]  ;;  %v1920_v2 = vperm.slane %v117_v51, 1  ;;  %v570_v3 = vld [vmem:[%s2417_s2 + $0x100] sm:$0xff]  ;;  %v65_v34 = vadd.s32 104, %v1900_v58  ;;  %v66_v36 = vadd.s32 112, %v1900_v58 }
  0x15   :  { %723 = vmatpush.msra.mxu1 %v561_v35  ;;  %950 = vmatpush.msra.mxu3 %v592_v37  ;;  %v539_v63 = vld [vmem:[%s2417_s2 + $0x8] sm:$0xff]  ;;  %v586_v4 = vld [vmem:[%s2417_s2 + $0x180] sm:$0xff]  ;;  %vm124_vm0 = vcmp.eq.s32.totalorder %v1900_v58, %v1902_v59  ;;  %vm125_vm1 = vcmp.eq.s32.totalorder %v1900_v58, %v1904_v60  ;;  %vm122_vm2 = vcmp.eq.s32.totalorder %v1900_v58, %v1918_v1  ;;  %v1155_v11 = vld [vmem:[%s2419_s1 + $0x10] sm:$0xff] }
  0x16   :  { %611 = vmatpush.msra.mxu0 %v544_v38  ;;  %838 = vmatpush.msra.mxu2 %v575_v40  ;;  %v555_v0 = vld [vmem:[%s2417_s2 + $0x88] sm:$0xff]  ;;  %v538_v5 = vld [vmem:[%s2417_s2] sm:$0xff]  ;;  %vm123_vm3 = vcmp.eq.s32.totalorder %v1900_v58, %v1920_v2  ;;  %vm128_vm4 = vcmp.eq.s32.totalorder %v53_v8, %v1902_v59  ;;  %vm129_vm5 = vcmp.eq.s32.totalorder %v53_v8, %v1904_v60  ;;  %v1156_v14 = vld [vmem:[%s2419_s1 + $0x18] sm:$0xff]  ;;  %v67_v38 = vadd.s32 120, %v1900_v58 }
  0x17   :  { %724 = vmatpush.msra.mxu1 %v560_v39  ;;  %951 = vmatpush.msra.mxu3 %v591_v41  ;;  %v554_v6 = vld [vmem:[%s2417_s2 + $0x80] sm:$0xff]  ;;  %vm126_vm6 = vcmp.eq.s32.totalorder %v53_v8, %v1918_v1  ;;  %vm127_vm7 = vcmp.eq.s32.totalorder %v53_v8, %v1920_v2  ;;  %v1154_v13 = vld [vmem:[%s2419_s1 + $0x8] sm:$0xff]  ;;  %vm132_vm8 = vcmp.eq.s32.totalorder %v54_v12, %v1902_v59  ;;  %v1159_v18 = vld [vmem:[%s2419_s1 + $0x30] sm:$0xff]  ;;  %v68_v40 = vadd.s32 128, %v1900_v58 }
  0x18   :  { %612 = vmatpush.msra.mxu0 %v543_v42  ;;  %839 = vmatpush.msra.mxu2 %v574_v44  ;;  %v1153_v9 = vld [vmem:[%s2419_s1] sm:$0xff]  ;;  %vm133_vm9 = vcmp.eq.s32.totalorder %v54_v12, %v1904_v60  ;;  %vm130_vm10 = vcmp.eq.s32.totalorder %v54_v12, %v1918_v1  ;;  %vm131_vm11 = vcmp.eq.s32.totalorder %v54_v12, %v1920_v2  ;;  %v1160_v21 = vld [vmem:[%s2419_s1 + $0x38] sm:$0xff]  ;;  %v1158_v23 = vld [vmem:[%s2419_s1 + $0x28] sm:$0xff] }
  0x19   :  { %725 = vmatpush.msra.mxu1 %v559_v43  ;;  %952 = vmatpush.msra.mxu3 %v590_v45  ;;  %vm136_vm12 = vcmp.eq.s32.totalorder %v55_v15, %v1902_v59  ;;  %vm137_vm13 = vcmp.eq.s32.totalorder %v55_v15, %v1904_v60  ;;  %vm134_vm14 = vcmp.eq.s32.totalorder %v55_v15, %v1918_v1  ;;  %v1157_v20 = vld [vmem:[%s2419_s1 + $0x20] sm:$0xff]  ;;  %v1162_v25 = vld [vmem:[%s2419_s1 + $0x48] sm:$0xff]  ;;  %v1163_v27 = vld [vmem:[%s2419_s1 + $0x50] sm:$0xff] }
  0x1a   :  { %613 = vmatpush.msra.mxu0 %v542_v46  ;;  %840 = vmatpush.msra.mxu2 %v573_v49  ;;  %vm135_vm15 = vcmp.eq.s32.totalorder %v55_v15, %v1920_v2  ;;  %v1161_v29 = vld [vmem:[%s2419_s1 + $0x40] sm:$0xff]  ;;  %v1166_v33 = vld [vmem:[%s2419_s1 + $0x68] sm:$0xff]  ;;  %v1164_v35 = vld [vmem:[%s2419_s1 + $0x58] sm:$0xff] }
  0x1b   :  { %726 = vmatpush.msra.mxu1 %v558_v47  ;;  %953 = vmatpush.msra.mxu3 %v589_v50  ;;  %v1165_v31 = vld [vmem:[%s2419_s1 + $0x60] sm:$0xff]  ;;  %v1168_v37 = vld [vmem:[%s2419_s1 + $0x78] sm:$0xff]  ;;  %v1167_v41 = vld [vmem:[%s2419_s1 + $0x70] sm:$0xff]  ;;  %v69_v47 = vadd.s32 136, %v1900_v58 }
  0x1c   :  { %614 = vmatpush.msra.mxu0 %v541_v52  ;;  %841 = vmatpush.msra.mxu2 %v572_v54  ;;  %v1169_v39 = vld [vmem:[%s2419_s1 + $0x80] sm:$0xff]  ;;  %v1172_v42 = vld [vmem:[%s2419_s1 + $0x98] sm:$0xff]  ;;  %v1171_v43 = vld [vmem:[%s2419_s1 + $0x90] sm:$0xff] }
  0x1d   :  { %727 = vmatpush.msra.mxu1 %v557_v53  ;;  %954 = vmatpush.msra.mxu3 %v588_v55  ;;  %v1175_v53 = vld [vmem:[%s2419_s1 + $0xb0] sm:$0xff]  ;;  %v1174_v54 = vld [vmem:[%s2419_s1 + $0xa8] sm:$0xff] }
  0x1e   :  { %615 = vmatpush.msra.mxu0 %v540_v56  ;;  %842 = vmatpush.msra.mxu2 %v571_v61  ;;  %v70_v61 = vadd.s32 144, %v1900_v58  ;;  %v1178_v8 = vld [vmem:[%s2419_s1 + $0xc8] sm:$0xff] }
  0x1f   :  { %728 = vmatpush.msra.mxu1 %v556_v57  ;;  %955 = vmatpush.msra.mxu3 %v587_v62 }
  0x20   :  { %616 = vmatpush.msra.mxu0 %v539_v63  ;;  %843 = vmatpush.msra.mxu2 %v570_v3 }
  0x21   :  { %729 = vmatpush.msra.mxu1 %v555_v0  ;;  %956 = vmatpush.msra.mxu3 %v586_v4 }
  0x22   :  { %1637 = vmatmul.msk.f32.vlgmr.msra.gmra.mxu2 %vm124_vm0, %v1707_v7  ;;  %1669 = vmatmul.msk.f32.vlgmr.msra.gmra.mxu3 %vm125_vm1, %v1707_v7  ;;  %vm140_vm0 = vcmp.eq.s32.totalorder %v56_v16, %v1902_v59  ;;  %vm141_vm1 = vcmp.eq.s32.totalorder %v56_v16, %v1904_v60 }
  0x23   :  { %617 = vmatpush.msra.mxu0 %v538_v5  ;;  %730 = vmatpush.msra.mxu1 %v554_v6 }
  0x24   :  { %1573 = vmatmul.msk.f32.vlgmr.msra.gmra.mxu0 %vm122_vm2, %v1707_v7  ;;  %1605 = vmatmul.msk.f32.vlgmr.msra.gmra.mxu1 %vm123_vm3, %v1707_v7  ;;  %vm138_vm2 = vcmp.eq.s32.totalorder %v56_v16, %v1918_v1  ;;  %vm139_vm3 = vcmp.eq.s32.totalorder %v56_v16, %v1920_v2 }
  0x25   :  { %1704 = vset.pattern.permute.xlu0 %v1708_v10  ;;  %1705 = vset.pattern.permute.xlu1 %v1708_v10 }
  0x26   :  { %1187 = vperm.xlu0 %1704, %v1153_v9   ;;  %1706 = vset.pattern.permute.xlu2 %v1708_v10  ;;  %v1177_v9 = vld [vmem:[%s2419_s1 + $0xc0] sm:$0xff] }
  0x27   :  { %1197 = vperm.xlu1 %1705, %v1155_v11   ;;  %1207 = vperm.xlu2 %1706, %v1157_v20  }
  0x2a   :  { %1638 = vmatmul.msk.f32.gmra.mxu2 %vm128_vm4, %v1707_v7  ;;  %1670 = vmatmul.msk.f32.gmra.mxu3 %vm129_vm5, %v1707_v7  ;;  %vm144_vm4 = vcmp.eq.s32.totalorder %v57_v17, %v1902_v59  ;;  %vm145_vm5 = vcmp.eq.s32.totalorder %v57_v17, %v1904_v60 }
  0x2c   :  { %1574 = vmatmul.msk.f32.gmra.mxu0 %vm126_vm6, %v1707_v7  ;;  %1606 = vmatmul.msk.f32.gmra.mxu1 %vm127_vm7, %v1707_v7  ;;  %vm142_vm6 = vcmp.eq.s32.totalorder %v57_v17, %v1918_v1  ;;  %vm143_vm7 = vcmp.eq.s32.totalorder %v57_v17, %v1920_v2 }
  0x2e   :  { %1192 = vperm.xlu0 %1704, %v1154_v13   ;;  %v71_v13 = vadd.s32 152, %v1900_v58 }
  0x2f   :  { %1202 = vperm.xlu1 %1705, %v1156_v14   ;;  %1212 = vperm.xlu2 %1706, %v1158_v23   ;;  %v1180_v23 = vld [vmem:[%s2419_s1 + $0xd8] sm:$0xff] }
  0x32   :  { %1639 = vmatmul.msk.f32.gmra.mxu2 %vm132_vm8, %v1707_v7  ;;  %1671 = vmatmul.msk.f32.gmra.mxu3 %vm133_vm9, %v1707_v7  ;;  %vm148_vm8 = vcmp.eq.s32.totalorder %v58_v19, %v1902_v59  ;;  %vm149_vm9 = vcmp.eq.s32.totalorder %v58_v19, %v1904_v60 }
  0x34   :  { %1575 = vmatmul.msk.f32.gmra.mxu0 %vm130_vm10, %v1707_v7  ;;  %1607 = vmatmul.msk.f32.gmra.mxu1 %vm131_vm11, %v1707_v7  ;;  %vm146_vm10 = vcmp.eq.s32.totalorder %v58_v19, %v1918_v1  ;;  %vm147_vm11 = vcmp.eq.s32.totalorder %v58_v19, %v1920_v2 }
  0x36   :  { %1217 = vperm.xlu0 %1704, %v1159_v18  }
  0x37   :  { %1222 = vperm.xlu1 %1705, %v1160_v21   ;;  %1227 = vperm.xlu2 %1706, %v1161_v29   ;;  %v1170_v21 = vld [vmem:[%s2419_s1 + $0x88] sm:$0xff] }
  0x3a   :  { %1640 = vmatmul.msk.f32.gmra.mxu2 %vm136_vm12, %v1707_v7  ;;  %1672 = vmatmul.msk.f32.gmra.mxu3 %vm137_vm13, %v1707_v7  ;;  %vm152_vm12 = vcmp.eq.s32.totalorder %v59_v22, %v1902_v59  ;;  %vm153_vm13 = vcmp.eq.s32.totalorder %v59_v22, %v1904_v60 }
  0x3c   :  { %1576 = vmatmul.msk.f32.gmra.mxu0 %vm134_vm14, %v1707_v7  ;;  %1608 = vmatmul.msk.f32.gmra.mxu1 %vm135_vm15, %v1707_v7  ;;  %vm150_vm14 = vcmp.eq.s32.totalorder %v59_v22, %v1918_v1  ;;  %vm151_vm15 = vcmp.eq.s32.totalorder %v59_v22, %v1920_v2  ;;  %v1181_v22 = vld [vmem:[%s2419_s1 + $0xe0] sm:$0xff] }
  0x3e   :  { %1232 = vperm.xlu0 %1704, %v1162_v25  }
  0x3f   :  { %1237 = vperm.xlu1 %1705, %v1163_v27   ;;  %1242 = vperm.xlu2 %1706, %v1164_v35   ;;  %v72_v27 = vadd.s32 160, %v1900_v58  ;;  %v1184_v35 = vld [vmem:[%s2419_s1 + $0xf8] sm:$0xff] }
  0x42   :  { %1641 = vmatmul.msk.f32.gmra.mxu2 %vm140_vm0, %v1707_v7  ;;  %1673 = vmatmul.msk.f32.gmra.mxu3 %vm141_vm1, %v1707_v7  ;;  %vm156_vm0 = vcmp.eq.s32.totalorder %v60_v24, %v1902_v59  ;;  %vm157_vm1 = vcmp.eq.s32.totalorder %v60_v24, %v1904_v60 }
  0x44   :  { %1577 = vmatmul.msk.f32.gmra.mxu0 %vm138_vm2, %v1707_v7  ;;  %1609 = vmatmul.msk.f32.gmra.mxu1 %vm139_vm3, %v1707_v7  ;;  %vm154_vm2 = vcmp.eq.s32.totalorder %v60_v24, %v1918_v1  ;;  %vm155_vm3 = vcmp.eq.s32.totalorder %v60_v24, %v1920_v2 }
  0x46   :  { %1247 = vperm.xlu0 %1704, %v1165_v31  }
  0x47   :  { %1252 = vperm.xlu1 %1705, %v1166_v33   ;;  %1257 = vperm.xlu2 %1706, %v1167_v41  }
  0x4a   :  { %1642 = vmatmul.msk.f32.gmra.mxu2 %vm144_vm4, %v1707_v7  ;;  %1674 = vmatmul.msk.f32.gmra.mxu3 %vm145_vm5, %v1707_v7  ;;  %vm160_vm4 = vcmp.eq.s32.totalorder %v61_v26, %v1902_v59  ;;  %vm161_vm5 = vcmp.eq.s32.totalorder %v61_v26, %v1904_v60 }
  0x4c   :  { %1578 = vmatmul.msk.f32.gmra.mxu0 %vm142_vm6, %v1707_v7  ;;  %1610 = vmatmul.msk.f32.gmra.mxu1 %vm143_vm7, %v1707_v7  ;;  %vm158_vm6 = vcmp.eq.s32.totalorder %v61_v26, %v1918_v1  ;;  %vm159_vm7 = vcmp.eq.s32.totalorder %v61_v26, %v1920_v2 }
  0x4e   :  { %1262 = vperm.xlu0 %1704, %v1168_v37  }
  0x4f   :  { %1267 = vperm.xlu1 %1705, %v1169_v39   ;;  %1272 = vperm.xlu2 %1706, %v1170_v21  }
  0x52   :  { %1643 = vmatmul.msk.f32.gmra.mxu2 %vm148_vm8, %v1707_v7  ;;  %1675 = vmatmul.msk.f32.gmra.mxu3 %vm149_vm9, %v1707_v7  ;;  %vm164_vm8 = vcmp.eq.s32.totalorder %v62_v28, %v1902_v59  ;;  %vm165_vm9 = vcmp.eq.s32.totalorder %v62_v28, %v1904_v60 }
  0x54   :  { %1579 = vmatmul.msk.f32.gmra.mxu0 %vm146_vm10, %v1707_v7  ;;  %1611 = vmatmul.msk.f32.gmra.mxu1 %vm147_vm11, %v1707_v7  ;;  %vm162_vm10 = vcmp.eq.s32.totalorder %v62_v28, %v1918_v1  ;;  %vm163_vm11 = vcmp.eq.s32.totalorder %v62_v28, %v1920_v2 }
  0x56   :  { %1277 = vperm.xlu0 %1704, %v1171_v43  }
  0x57   :  { %1282 = vperm.xlu1 %1705, %v1172_v42  }
  0x5a   :  { %1644 = vmatmul.msk.f32.gmra.mxu2 %vm152_vm12, %v1707_v7  ;;  %1676 = vmatmul.msk.f32.gmra.mxu3 %vm153_vm13, %v1707_v7  ;;  %vm168_vm12 = vcmp.eq.s32.totalorder %v63_v30, %v1902_v59  ;;  %vm169_vm13 = vcmp.eq.s32.totalorder %v63_v30, %v1904_v60 }
  0x5c   :  { %1580 = vmatmul.msk.f32.gmra.mxu0 %vm150_vm14, %v1707_v7  ;;  %1612 = vmatmul.msk.f32.gmra.mxu1 %vm151_vm15, %v1707_v7  ;;  %vm166_vm14 = vcmp.eq.s32.totalorder %v63_v30, %v1918_v1  ;;  %vm167_vm15 = vcmp.eq.s32.totalorder %v63_v30, %v1920_v2 }
  0x5e   :  { %1292 = vperm.xlu0 %1704, %v1174_v54  }
  0x5f   :  { %1297 = vperm.xlu1 %1705, %v1175_v53  }
  0x62   :  { %1645 = vmatmul.msk.f32.gmra.mxu2 %vm156_vm0, %v1707_v7  ;;  %1677 = vmatmul.msk.f32.gmra.mxu3 %vm157_vm1, %v1707_v7  ;;  %vm172_vm0 = vcmp.eq.s32.totalorder %v64_v32, %v1902_v59  ;;  %vm173_vm1 = vcmp.eq.s32.totalorder %v64_v32, %v1904_v60 }
  0x64   :  { %1581 = vmatmul.msk.f32.gmra.mxu0 %vm154_vm2, %v1707_v7  ;;  %1613 = vmatmul.msk.f32.gmra.mxu1 %vm155_vm3, %v1707_v7  ;;  %vm170_vm2 = vcmp.eq.s32.totalorder %v64_v32, %v1918_v1  ;;  %vm171_vm3 = vcmp.eq.s32.totalorder %v64_v32, %v1920_v2 }
  0x66   :  { %1307 = vperm.xlu0 %1704, %v1177_v9  }
  0x67   :  { %1312 = vperm.xlu1 %1705, %v1178_v8  }
  0x6a   :  { %1646 = vmatmul.msk.f32.gmra.mxu2 %vm160_vm4, %v1707_v7  ;;  %1678 = vmatmul.msk.f32.gmra.mxu3 %vm161_vm5, %v1707_v7  ;;  %vm176_vm4 = vcmp.eq.s32.totalorder %v65_v34, %v1902_v59  ;;  %vm177_vm5 = vcmp.eq.s32.totalorder %v65_v34, %v1904_v60 }
  0x6c   :  { %1582 = vmatmul.msk.f32.gmra.mxu0 %vm158_vm6, %v1707_v7  ;;  %1614 = vmatmul.msk.f32.gmra.mxu1 %vm159_vm7, %v1707_v7  ;;  %vm174_vm6 = vcmp.eq.s32.totalorder %v65_v34, %v1918_v1  ;;  %vm175_vm7 = vcmp.eq.s32.totalorder %v65_v34, %v1920_v2 }
  0x6e   :  { %1322 = vperm.xlu0 %1704, %v1180_v23  }
  0x6f   :  { %1327 = vperm.xlu1 %1705, %v1181_v22  }
  0x72   :  { %1647 = vmatmul.msk.f32.gmra.mxu2 %vm164_vm8, %v1707_v7  ;;  %1679 = vmatmul.msk.f32.gmra.mxu3 %vm165_vm9, %v1707_v7  ;;  %vm180_vm8 = vcmp.eq.s32.totalorder %v66_v36, %v1902_v59  ;;  %vm181_vm9 = vcmp.eq.s32.totalorder %v66_v36, %v1904_v60 }
  0x74   :  { %1583 = vmatmul.msk.f32.gmra.mxu0 %vm162_vm10, %v1707_v7  ;;  %1615 = vmatmul.msk.f32.gmra.mxu1 %vm163_vm11, %v1707_v7  ;;  %vm178_vm10 = vcmp.eq.s32.totalorder %v66_v36, %v1918_v1  ;;  %vm179_vm11 = vcmp.eq.s32.totalorder %v66_v36, %v1920_v2  ;;  %v1183_v36 = vld [vmem:[%s2419_s1 + $0xf0] sm:$0xff] }
  0x76   :  { %1337 = vperm.xlu0 %1704, %v1183_v36  }
  0x77   :  { %1342 = vperm.xlu1 %1705, %v1184_v35  }
  0x7a   :  { %1648 = vmatmul.msk.f32.gmra.mxu2 %vm168_vm12, %v1707_v7  ;;  %1680 = vmatmul.msk.f32.gmra.mxu3 %vm169_vm13, %v1707_v7  ;;  %vm184_vm12 = vcmp.eq.s32.totalorder %v67_v38, %v1902_v59  ;;  %vm185_vm13 = vcmp.eq.s32.totalorder %v67_v38, %v1904_v60 }
  0x7c   :  { %1584 = vmatmul.msk.f32.gmra.mxu0 %vm166_vm14, %v1707_v7  ;;  %1616 = vmatmul.msk.f32.gmra.mxu1 %vm167_vm15, %v1707_v7  ;;  %vm182_vm14 = vcmp.eq.s32.totalorder %v67_v38, %v1918_v1  ;;  %vm183_vm15 = vcmp.eq.s32.totalorder %v67_v38, %v1920_v2 }
  0x82   :  { %1649 = vmatmul.msk.f32.gmra.mxu2 %vm172_vm0, %v1707_v7  ;;  %1681 = vmatmul.msk.f32.gmra.mxu3 %vm173_vm1, %v1707_v7  ;;  %vm188_vm0 = vcmp.eq.s32.totalorder %v68_v40, %v1902_v59  ;;  %vm189_vm1 = vcmp.eq.s32.totalorder %v68_v40, %v1904_v60 }
  0x84   :  { %1585 = vmatmul.msk.f32.gmra.mxu0 %vm170_vm2, %v1707_v7  ;;  %1617 = vmatmul.msk.f32.gmra.mxu1 %vm171_vm3, %v1707_v7  ;;  %vm186_vm2 = vcmp.eq.s32.totalorder %v68_v40, %v1918_v1  ;;  %vm187_vm3 = vcmp.eq.s32.totalorder %v68_v40, %v1920_v2  ;;  %v73_v40 = vadd.s32 168, %v1900_v58 }
  0x8a   :  { %1650 = vmatmul.msk.f32.gmra.mxu2 %vm176_vm4, %v1707_v7  ;;  %1682 = vmatmul.msk.f32.gmra.mxu3 %vm177_vm5, %v1707_v7  ;;  %vm192_vm4 = vcmp.eq.s32.totalorder %v69_v47, %v1902_v59  ;;  %vm193_vm5 = vcmp.eq.s32.totalorder %v69_v47, %v1904_v60 }
  0x8c   :  { %1586 = vmatmul.msk.f32.gmra.mxu0 %vm174_vm6, %v1707_v7  ;;  %1618 = vmatmul.msk.f32.gmra.mxu1 %vm175_vm7, %v1707_v7  ;;  %vm190_vm6 = vcmp.eq.s32.totalorder %v69_v47, %v1918_v1  ;;  %vm191_vm7 = vcmp.eq.s32.totalorder %v69_v47, %v1920_v2 }
  0x92   :  { %1651 = vmatmul.msk.f32.gmra.mxu2 %vm180_vm8, %v1707_v7  ;;  %1683 = vmatmul.msk.f32.gmra.mxu3 %vm181_vm9, %v1707_v7  ;;  %vm196_vm8 = vcmp.eq.s32.totalorder %v70_v61, %v1902_v59  ;;  %vm197_vm9 = vcmp.eq.s32.totalorder %v70_v61, %v1904_v60 }
  0x94   :  { %1587 = vmatmul.msk.f32.gmra.mxu0 %vm178_vm10, %v1707_v7  ;;  %1619 = vmatmul.msk.f32.gmra.mxu1 %vm179_vm11, %v1707_v7  ;;  %vm194_vm10 = vcmp.eq.s32.totalorder %v70_v61, %v1918_v1  ;;  %vm195_vm11 = vcmp.eq.s32.totalorder %v70_v61, %v1920_v2 }
  0x98   :  { %v1188_v51 = vpop.permute.xlu0 %1187 }
  0x99   :  { %v1198_v19 = vpop.permute.xlu1 %1197 }
  0x9a   :  { %1652 = vmatmul.msk.f32.gmra.mxu2 %vm184_vm12, %v1707_v7  ;;  %1684 = vmatmul.msk.f32.gmra.mxu3 %vm185_vm13, %v1707_v7  ;;  %vm200_vm12 = vcmp.eq.s32.totalorder %v71_v13, %v1902_v59  ;;  %vm201_vm13 = vcmp.eq.s32.totalorder %v71_v13, %v1904_v60 }
  0x9c   :  { %1588 = vmatmul.msk.f32.gmra.mxu0 %vm182_vm14, %v1707_v7  ;;  %1620 = vmatmul.msk.f32.gmra.mxu1 %vm183_vm15, %v1707_v7  ;;  %vm198_vm14 = vcmp.eq.s32.totalorder %v71_v13, %v1918_v1  ;;  %vm199_vm15 = vcmp.eq.s32.totalorder %v71_v13, %v1920_v2 }
  0xa0   :  { %v1193_v6 = vpop.permute.xlu0 %1192 }
  0xa1   :  { %v619_v44 = vpop.f32.mrf.mxu0  ;;  %v732_v45 = vpop.f32.mrf.mxu1 }
  0xa2   :  { %1653 = vmatmul.msk.f32.gmra.mxu2 %vm188_vm0, %v1707_v7  ;;  %v733_v46 = vadd.f32 %v732_v45, %v619_v44  ;;  %1685 = vmatmul.msk.f32.gmra.mxu3 %vm189_vm1, %v1707_v7  ;;  %vm204_vm0 = vcmp.eq.s32.totalorder %v72_v27, %v1902_v59  ;;  %vm205_vm1 = vcmp.eq.s32.totalorder %v72_v27, %v1904_v60  ;;  %v1203_v34 = vpop.permute.xlu1 %1202 }
  0xa4   :  { %1589 = vmatmul.msk.f32.gmra.mxu0 %vm186_vm2, %v1707_v7  ;;  %1621 = vmatmul.msk.f32.gmra.mxu1 %vm187_vm3, %v1707_v7  ;;  %vm202_vm2 = vcmp.eq.s32.totalorder %v72_v27, %v1918_v1  ;;  %vm203_vm3 = vcmp.eq.s32.totalorder %v72_v27, %v1920_v2 }
  0xa5   :  { %v845_v48 = vpop.f32.mrf.mxu2  ;;  %v958_v49 = vpop.f32.mrf.mxu3 }
  0xa6   :  { %v846_v50 = vadd.f32 %v845_v48, %v733_v46  ;;  %v1208_v46 = vpop.permute.xlu2 %1207  ;;  %v1173_v48 = vld [vmem:[%s2419_s1 + $0xa0] sm:$0xff] }
  0xa7   :  { %1287 = vperm.xlu2 %1706, %v1173_v48  }
  0xa8   :  { %v959_v52 = vadd.f32 %v958_v49, %v846_v50  ;;  %v1218_v13 = vpop.permute.xlu0 %1217 }
  0xa9   :  { %v622_v55 = vpop.f32.mrf.mxu0  ;;  %v735_v56 = vpop.f32.mrf.mxu1 }
  0xaa   :  { %1654 = vmatmul.msk.f32.gmra.mxu2 %vm192_vm4, %v1707_v7  ;;  %v736_v57 = vadd.f32 %v735_v56, %v622_v55  ;;  %1686 = vmatmul.msk.f32.gmra.mxu3 %vm193_vm5, %v1707_v7  ;;  %v1345_v62 = vmul.f32 %v1188_v51, %v959_v52  ;;  %vm208_vm4 = vcmp.eq.s32.totalorder %v73_v40, %v1902_v59  ;;  %v74_v52 = vadd.s32 176, %v1900_v58 }
  0xab   :  { %vm209_vm5 = vcmp.eq.s32.totalorder %v73_v40, %v1904_v60 }
  0xac   :  { %1590 = vmatmul.msk.f32.gmra.mxu0 %vm190_vm6, %v1707_v7  ;;  %1622 = vmatmul.msk.f32.gmra.mxu1 %vm191_vm7, %v1707_v7  ;;  %v1377_v4 = vmax.f32 %v1345_v62, 0.0  ;;  %vm206_vm6 = vcmp.eq.s32.totalorder %v73_v40, %v1918_v1  ;;  %vm207_vm7 = vcmp.eq.s32.totalorder %v73_v40, %v1920_v2 }
  0xad   :  { %v848_v63 = vpop.f32.mrf.mxu2  ;;  %v961_v0 = vpop.f32.mrf.mxu3 }
  0xae   :  { %v849_v3 = vadd.f32 %v848_v63, %v736_v57  ;;  %1409 = vst [vmem:[%s2420_s3] sm:$0xff] %v1377_v4  ;;  %v1213_v62 = vpop.permute.xlu2 %1212  ;;  %v1176_v63 = vld [vmem:[%s2419_s1 + $0xb8] sm:$0xff] }
  0xaf   :  { %1302 = vperm.xlu2 %1706, %v1176_v63  }
  0xb0   :  { %v962_v5 = vadd.f32 %v961_v0, %v849_v3  ;;  %v1233_v48 = vpop.permute.xlu0 %1232 }
  0xb1   :  { %v625_v10 = vpop.f32.mrf.mxu0  ;;  %v738_v11 = vpop.f32.mrf.mxu1 }
  0xb2   :  { %1655 = vmatmul.msk.f32.gmra.mxu2 %vm196_vm8, %v1707_v7  ;;  %v739_v12 = vadd.f32 %v738_v11, %v625_v10  ;;  %1687 = vmatmul.msk.f32.gmra.mxu3 %vm197_vm9, %v1707_v7  ;;  %v1346_v14 = vmul.f32 %v1193_v6, %v962_v5  ;;  %vm212_vm8 = vcmp.eq.s32.totalorder %v74_v52, %v1902_v59  ;;  %v75_v5 = vadd.s32 184, %v1900_v58 }
  0xb3   :  { %vm213_vm9 = vcmp.eq.s32.totalorder %v74_v52, %v1904_v60 }
  0xb4   :  { %1591 = vmatmul.msk.f32.gmra.mxu0 %vm194_vm10, %v1707_v7  ;;  %1623 = vmatmul.msk.f32.gmra.mxu1 %vm195_vm11, %v1707_v7  ;;  %v1378_v18 = vmax.f32 %v1346_v14, 0.0  ;;  %vm210_vm10 = vcmp.eq.s32.totalorder %v74_v52, %v1918_v1  ;;  %vm211_vm11 = vcmp.eq.s32.totalorder %v74_v52, %v1920_v2  ;;  %v1179_v14 = vld [vmem:[%s2419_s1 + $0xd0] sm:$0xff]  ;;  %v79_v52 = vadd.s32 216, %v1900_v58 }
  0xb5   :  { %v851_v15 = vpop.f32.mrf.mxu2  ;;  %v964_v16 = vpop.f32.mrf.mxu3 }
  0xb6   :  { %v852_v17 = vadd.f32 %v851_v15, %v739_v12  ;;  %1410 = vst [vmem:[%s2420_s3 + $0x8] sm:$0xff] %v1378_v18  ;;  %v76_v18 = vadd.s32 192, %v1900_v58 }
  0xb7   :  { %1317 = vperm.xlu2 %1706, %v1179_v14  }
  0xb8   :  { %v965_v20 = vadd.f32 %v964_v16, %v852_v17 }
  0xb9   :  { %v628_v24 = vpop.f32.mrf.mxu0  ;;  %v741_v25 = vpop.f32.mrf.mxu1 }
  0xba   :  { %1656 = vmatmul.msk.f32.gmra.mxu2 %vm200_vm12, %v1707_v7  ;;  %v742_v26 = vadd.f32 %v741_v25, %v628_v24  ;;  %1688 = vmatmul.msk.f32.gmra.mxu3 %vm201_vm13, %v1707_v7  ;;  %v1347_v28 = vmul.f32 %v1198_v19, %v965_v20  ;;  %vm216_vm12 = vcmp.eq.s32.totalorder %v75_v5, %v1902_v59  ;;  %v1223_v25 = vpop.permute.xlu1 %1222 }
  0xbb   :  { %vm217_vm13 = vcmp.eq.s32.totalorder %v75_v5, %v1904_v60 }
  0xbc   :  { %1592 = vmatmul.msk.f32.gmra.mxu0 %vm198_vm14, %v1707_v7  ;;  %1624 = vmatmul.msk.f32.gmra.mxu1 %vm199_vm15, %v1707_v7  ;;  %v1379_v32 = vmax.f32 %v1347_v28, 0.0  ;;  %vm214_vm14 = vcmp.eq.s32.totalorder %v75_v5, %v1918_v1  ;;  %vm215_vm15 = vcmp.eq.s32.totalorder %v75_v5, %v1920_v2 }
  0xbd   :  { %v854_v29 = vpop.f32.mrf.mxu2  ;;  %v967_v30 = vpop.f32.mrf.mxu3 }
  0xbe   :  { %v855_v31 = vadd.f32 %v854_v29, %v742_v26  ;;  %1411 = vst [vmem:[%s2420_s3 + $0x10] sm:$0xff] %v1379_v32  ;;  %v1182_v26 = vld [vmem:[%s2419_s1 + $0xe8] sm:$0xff] }
  0xbf   :  { %1332 = vperm.xlu2 %1706, %v1182_v26  }
  0xc0   :  { %v968_v33 = vadd.f32 %v967_v30, %v855_v31  ;;  %v77_v30 = vadd.s32 200, %v1900_v58 }
  0xc1   :  { %v631_v37 = vpop.f32.mrf.mxu0  ;;  %v744_v38 = vpop.f32.mrf.mxu1 }
  0xc2   :  { %1657 = vmatmul.msk.f32.gmra.mxu2 %vm204_vm0, %v1707_v7  ;;  %v745_v39 = vadd.f32 %v744_v38, %v631_v37  ;;  %1689 = vmatmul.msk.f32.gmra.mxu3 %vm205_vm1, %v1707_v7  ;;  %v1348_v41 = vmul.f32 %v1203_v34, %v968_v33  ;;  %vm220_vm0 = vcmp.eq.s32.totalorder %v76_v18, %v1902_v59  ;;  %v1228_v37 = vpop.permute.xlu2 %1227 }
  0xc3   :  { %vm221_vm1 = vcmp.eq.s32.totalorder %v76_v18, %v1904_v60 }
  0xc4   :  { %1593 = vmatmul.msk.f32.gmra.mxu0 %vm202_vm2, %v1707_v7  ;;  %1625 = vmatmul.msk.f32.gmra.mxu1 %vm203_vm3, %v1707_v7  ;;  %v1380_v45 = vmax.f32 %v1348_v41, 0.0  ;;  %vm218_vm2 = vcmp.eq.s32.totalorder %v76_v18, %v1918_v1  ;;  %vm219_vm3 = vcmp.eq.s32.totalorder %v76_v18, %v1920_v2  ;;  %v78_v41 = vadd.s32 208, %v1900_v58 }
  0xc5   :  { %v857_v42 = vpop.f32.mrf.mxu2  ;;  %v970_v43 = vpop.f32.mrf.mxu3 }
  0xc6   :  { %v858_v44 = vadd.f32 %v857_v42, %v745_v39  ;;  %1412 = vst [vmem:[%s2420_s3 + $0x18] sm:$0xff] %v1380_v45 }
  0xc8   :  { %v971_v47 = vadd.f32 %v970_v43, %v858_v44 }
  0xc9   :  { %v634_v49 = vpop.f32.mrf.mxu0  ;;  %v747_v50 = vpop.f32.mrf.mxu1 }
  0xca   :  { %1658 = vmatmul.msk.f32.gmra.mxu2 %vm208_vm4, %v1707_v7  ;;  %v748_v51 = vadd.f32 %v747_v50, %v634_v49  ;;  %1690 = vmatmul.msk.f32.gmra.mxu3 %vm209_vm5, %v1707_v7  ;;  %v1349_v53 = vmul.f32 %v1208_v46, %v971_v47  ;;  %vm224_vm4 = vcmp.eq.s32.totalorder %v77_v30, %v1902_v59 }
  0xcb   :  { %vm225_vm5 = vcmp.eq.s32.totalorder %v77_v30, %v1904_v60 }
  0xcc   :  { %1594 = vmatmul.msk.f32.gmra.mxu0 %vm206_vm6, %v1707_v7  ;;  %1626 = vmatmul.msk.f32.gmra.mxu1 %vm207_vm7, %v1707_v7  ;;  %v1381_v57 = vmax.f32 %v1349_v53, 0.0  ;;  %vm222_vm6 = vcmp.eq.s32.totalorder %v77_v30, %v1918_v1  ;;  %vm223_vm7 = vcmp.eq.s32.totalorder %v77_v30, %v1920_v2 }
  0xcd   :  { %v860_v54 = vpop.f32.mrf.mxu2  ;;  %v973_v55 = vpop.f32.mrf.mxu3 }
  0xce   :  { %v861_v56 = vadd.f32 %v860_v54, %v748_v51  ;;  %1413 = vst [vmem:[%s2420_s3 + $0x20] sm:$0xff] %v1381_v57 }
  0xd0   :  { %v974_v61 = vadd.f32 %v973_v55, %v861_v56 }
  0xd1   :  { %v637_v0 = vpop.f32.mrf.mxu0  ;;  %v750_v3 = vpop.f32.mrf.mxu1 }
  0xd2   :  { %1659 = vmatmul.msk.f32.gmra.mxu2 %vm212_vm8, %v1707_v7  ;;  %v751_v4 = vadd.f32 %v750_v3, %v637_v0  ;;  %1691 = vmatmul.msk.f32.gmra.mxu3 %vm213_vm9, %v1707_v7  ;;  %v1350_v6 = vmul.f32 %v1213_v62, %v974_v61  ;;  %vm228_vm8 = vcmp.eq.s32.totalorder %v78_v41, %v1902_v59  ;;  %v1238_v62 = vpop.permute.xlu1 %1237 }
  0xd3   :  { %vm229_vm9 = vcmp.eq.s32.totalorder %v78_v41, %v1904_v60 }
  0xd4   :  { %1595 = vmatmul.msk.f32.gmra.mxu0 %vm210_vm10, %v1707_v7  ;;  %1627 = vmatmul.msk.f32.gmra.mxu1 %vm211_vm11, %v1707_v7  ;;  %v1382_v11 = vmax.f32 %v1350_v6, 0.0  ;;  %vm226_vm10 = vcmp.eq.s32.totalorder %v78_v41, %v1918_v1  ;;  %vm227_vm11 = vcmp.eq.s32.totalorder %v78_v41, %v1920_v2 }
  0xd5   :  { %v863_v8 = vpop.f32.mrf.mxu2  ;;  %v976_v9 = vpop.f32.mrf.mxu3 }
  0xd6   :  { %v864_v10 = vadd.f32 %v863_v8, %v751_v4  ;;  %1414 = vst [vmem:[%s2420_s3 + $0x28] sm:$0xff] %v1382_v11  ;;  %v80_v4 = vadd.s32 224, %v1900_v58 }
  0xd8   :  { %v977_v12 = vadd.f32 %v976_v9, %v864_v10 }
  0xd9   :  { %v640_v15 = vpop.f32.mrf.mxu0  ;;  %v753_v16 = vpop.f32.mrf.mxu1 }
  0xda   :  { %1660 = vmatmul.msk.f32.gmra.mxu2 %vm216_vm12, %v1707_v7  ;;  %v754_v17 = vadd.f32 %v753_v16, %v640_v15  ;;  %1692 = vmatmul.msk.f32.gmra.mxu3 %vm217_vm13, %v1707_v7  ;;  %v1351_v19 = vmul.f32 %v1218_v13, %v977_v12  ;;  %vm232_vm12 = vcmp.eq.s32.totalorder %v79_v52, %v1902_v59  ;;  %v1243_v12 = vpop.permute.xlu2 %1242  ;;  %v81_v16 = vadd.s32 232, %v1900_v58 }
  0xdb   :  { %vm233_vm13 = vcmp.eq.s32.totalorder %v79_v52, %v1904_v60 }
  0xdc   :  { %1596 = vmatmul.msk.f32.gmra.mxu0 %vm214_vm14, %v1707_v7  ;;  %1628 = vmatmul.msk.f32.gmra.mxu1 %vm215_vm15, %v1707_v7  ;;  %v1383_v23 = vmax.f32 %v1351_v19, 0.0  ;;  %vm230_vm14 = vcmp.eq.s32.totalorder %v79_v52, %v1918_v1  ;;  %vm231_vm15 = vcmp.eq.s32.totalorder %v79_v52, %v1920_v2 }
  0xdd   :  { %v866_v20 = vpop.f32.mrf.mxu2  ;;  %v979_v21 = vpop.f32.mrf.mxu3 }
  0xde   :  { %v867_v22 = vadd.f32 %v866_v20, %v754_v17  ;;  %1415 = vst [vmem:[%s2420_s3 + $0x30] sm:$0xff] %v1383_v23  ;;  %v1248_v23 = vpop.permute.xlu0 %1247 }
  0xe0   :  { %v980_v24 = vadd.f32 %v979_v21, %v867_v22 }
  0xe1   :  { %v643_v27 = vpop.f32.mrf.mxu0  ;;  %v756_v28 = vpop.f32.mrf.mxu1 }
  0xe2   :  { %1661 = vmatmul.msk.f32.gmra.mxu2 %vm220_vm0, %v1707_v7  ;;  %v757_v29 = vadd.f32 %v756_v28, %v643_v27  ;;  %1693 = vmatmul.msk.f32.gmra.mxu3 %vm221_vm1, %v1707_v7  ;;  %v1352_v31 = vmul.f32 %v1223_v25, %v980_v24  ;;  %vm236_vm0 = vcmp.eq.s32.totalorder %v80_v4, %v1902_v59  ;;  %v82_v27 = vadd.s32 240, %v1900_v58 }
  0xe3   :  { %vm237_vm1 = vcmp.eq.s32.totalorder %v80_v4, %v1904_v60 }
  0xe4   :  { %1597 = vmatmul.msk.f32.gmra.mxu0 %vm218_vm2, %v1707_v7  ;;  %1629 = vmatmul.msk.f32.gmra.mxu1 %vm219_vm3, %v1707_v7  ;;  %v1384_v35 = vmax.f32 %v1352_v31, 0.0  ;;  %vm234_vm2 = vcmp.eq.s32.totalorder %v80_v4, %v1918_v1  ;;  %vm235_vm3 = vcmp.eq.s32.totalorder %v80_v4, %v1920_v2 }
  0xe5   :  { %v869_v32 = vpop.f32.mrf.mxu2  ;;  %v982_v33 = vpop.f32.mrf.mxu3 }
  0xe6   :  { %v870_v34 = vadd.f32 %v869_v32, %v757_v29  ;;  %1416 = vst [vmem:[%s2420_s3 + $0x38] sm:$0xff] %v1384_v35 }
  0xe8   :  { %v983_v36 = vadd.f32 %v982_v33, %v870_v34  ;;  %v1253_v34 = vpop.permute.xlu1 %1252 }
  0xe9   :  { %v646_v38 = vpop.f32.mrf.mxu0  ;;  %v759_v39 = vpop.f32.mrf.mxu1 }
  0xea   :  { %1662 = vmatmul.msk.f32.gmra.mxu2 %vm224_vm4, %v1707_v7  ;;  %v760_v40 = vadd.f32 %v759_v39, %v646_v38  ;;  %1694 = vmatmul.msk.f32.gmra.mxu3 %vm225_vm5, %v1707_v7  ;;  %v1353_v42 = vmul.f32 %v1228_v37, %v983_v36  ;;  %vm240_vm4 = vcmp.eq.s32.totalorder %v81_v16, %v1902_v59  ;;  %v83_v38 = vadd.s32 248, %v1900_v58 }
  0xeb   :  { %vm241_vm5 = vcmp.eq.s32.totalorder %v81_v16, %v1904_v60 }
  0xec   :  { %1598 = vmatmul.msk.f32.gmra.mxu0 %vm222_vm6, %v1707_v7  ;;  %1630 = vmatmul.msk.f32.gmra.mxu1 %vm223_vm7, %v1707_v7  ;;  %v1385_v46 = vmax.f32 %v1353_v42, 0.0  ;;  %vm238_vm6 = vcmp.eq.s32.totalorder %v81_v16, %v1918_v1  ;;  %vm239_vm7 = vcmp.eq.s32.totalorder %v81_v16, %v1920_v2 }
  0xed   :  { %v872_v43 = vpop.f32.mrf.mxu2  ;;  %v985_v44 = vpop.f32.mrf.mxu3 }
  0xee   :  { %v873_v45 = vadd.f32 %v872_v43, %v760_v40  ;;  %1417 = vst [vmem:[%s2420_s3 + $0x40] sm:$0xff] %v1385_v46 }
  0xf0   :  { %v986_v47 = vadd.f32 %v985_v44, %v873_v45  ;;  %v1258_v45 = vpop.permute.xlu2 %1257 }
  0xf1   :  { %v649_v49 = vpop.f32.mrf.mxu0  ;;  %v762_v50 = vpop.f32.mrf.mxu1 }
  0xf2   :  { %1663 = vmatmul.msk.f32.gmra.mxu2 %vm228_vm8, %v1707_v7  ;;  %v763_v51 = vadd.f32 %v762_v50, %v649_v49  ;;  %1695 = vmatmul.msk.f32.gmra.mxu3 %vm229_vm9, %v1707_v7  ;;  %v1354_v53 = vmul.f32 %v1233_v48, %v986_v47  ;;  %vm244_vm8 = vcmp.eq.s32.totalorder %v82_v27, %v1902_v59 }
  0xf3   :  { %vm245_vm9 = vcmp.eq.s32.totalorder %v82_v27, %v1904_v60 }
  0xf4   :  { %1599 = vmatmul.msk.f32.gmra.mxu0 %vm226_vm10, %v1707_v7  ;;  %1631 = vmatmul.msk.f32.gmra.mxu1 %vm227_vm11, %v1707_v7  ;;  %v1386_v57 = vmax.f32 %v1354_v53, 0.0  ;;  %vm242_vm10 = vcmp.eq.s32.totalorder %v82_v27, %v1918_v1  ;;  %vm243_vm11 = vcmp.eq.s32.totalorder %v82_v27, %v1920_v2 }
  0xf5   :  { %v875_v54 = vpop.f32.mrf.mxu2  ;;  %v988_v55 = vpop.f32.mrf.mxu3 }
  0xf6   :  { %v876_v56 = vadd.f32 %v875_v54, %v763_v51  ;;  %1418 = vst [vmem:[%s2420_s3 + $0x48] sm:$0xff] %v1386_v57 }
  0xf8   :  { %v989_v61 = vadd.f32 %v988_v55, %v876_v56 }
  0xf9   :  { %v652_v63 = vpop.f32.mrf.mxu0  ;;  %v765_v0 = vpop.f32.mrf.mxu1 }
  0xfa   :  { %1664 = vmatmul.msk.f32.gmra.mxu2 %vm232_vm12, %v1707_v7  ;;  %v766_v3 = vadd.f32 %v765_v0, %v652_v63  ;;  %1696 = vmatmul.msk.f32.gmra.mxu3 %vm233_vm13, %v1707_v7  ;;  %v1355_v5 = vmul.f32 %v1238_v62, %v989_v61  ;;  %vm248_vm12 = vcmp.eq.s32.totalorder %v83_v38, %v1902_v59  ;;  %v1268_v62 = vpop.permute.xlu1 %1267 }
  0xfb   :  { %vm249_vm13 = vcmp.eq.s32.totalorder %v83_v38, %v1904_v60 }
  0xfc   :  { %1600 = vmatmul.msk.f32.gmra.mxu0 %vm230_vm14, %v1707_v7  ;;  %1632 = vmatmul.msk.f32.gmra.mxu1 %vm231_vm15, %v1707_v7  ;;  %v1387_v10 = vmax.f32 %v1355_v5, 0.0  ;;  %vm246_vm14 = vcmp.eq.s32.totalorder %v83_v38, %v1918_v1  ;;  %vm247_vm15 = vcmp.eq.s32.totalorder %v83_v38, %v1920_v2  ;;  %v1263_v1 = vpop.permute.xlu0 %1262 }
  0xfd   :  { %v878_v6 = vpop.f32.mrf.mxu2  ;;  %v991_v8 = vpop.f32.mrf.mxu3 }
  0xfe   :  { %v879_v9 = vadd.f32 %v878_v6, %v766_v3  ;;  %1419 = vst [vmem:[%s2420_s3 + $0x50] sm:$0xff] %v1387_v10 }
 0x100   :  { %v992_v11 = vadd.f32 %v991_v8, %v879_v9 }
 0x101   :  { %v655_v13 = vpop.f32.mrf.mxu0  ;;  %v768_v14 = vpop.f32.mrf.mxu1 }
 0x102   :  { %1665 = vmatmul.msk.f32.gmra.mxu2 %vm236_vm0, %v1707_v7  ;;  %v769_v15 = vadd.f32 %v768_v14, %v655_v13  ;;  %1697 = vmatmul.msk.f32.gmra.mxu3 %vm237_vm1, %v1707_v7  ;;  %v1356_v17 = vmul.f32 %v1243_v12, %v992_v11  ;;  %v1273_v11 = vpop.permute.xlu2 %1272 }
 0x104   :  { %1601 = vmatmul.msk.f32.gmra.mxu0 %vm234_vm2, %v1707_v7  ;;  %1633 = vmatmul.msk.f32.gmra.mxu1 %vm235_vm3, %v1707_v7  ;;  %v1388_v21 = vmax.f32 %v1356_v17, 0.0 }
 0x105   :  { %v881_v18 = vpop.f32.mrf.mxu2  ;;  %v994_v19 = vpop.f32.mrf.mxu3 }
 0x106   :  { %v882_v20 = vadd.f32 %v881_v18, %v769_v15  ;;  %1420 = vst [vmem:[%s2420_s3 + $0x58] sm:$0xff] %v1388_v21 }
 0x108   :  { %v995_v22 = vadd.f32 %v994_v19, %v882_v20 }
 0x109   :  { %v658_v24 = vpop.f32.mrf.mxu0  ;;  %v771_v25 = vpop.f32.mrf.mxu1 }
 0x10a   :  { %1666 = vmatmul.msk.f32.gmra.mxu2 %vm240_vm4, %v1707_v7  ;;  %v772_v26 = vadd.f32 %v771_v25, %v658_v24  ;;  %1698 = vmatmul.msk.f32.gmra.mxu3 %vm241_vm5, %v1707_v7  ;;  %v1357_v28 = vmul.f32 %v1248_v23, %v995_v22  ;;  %v1278_v24 = vpop.permute.xlu0 %1277 }
 0x10c   :  { %1602 = vmatmul.msk.f32.gmra.mxu0 %vm238_vm6, %v1707_v7  ;;  %1634 = vmatmul.msk.f32.gmra.mxu1 %vm239_vm7, %v1707_v7  ;;  %v1389_v32 = vmax.f32 %v1357_v28, 0.0 }
 0x10d   :  { %v884_v29 = vpop.f32.mrf.mxu2  ;;  %v997_v30 = vpop.f32.mrf.mxu3 }
 0x10e   :  { %v885_v31 = vadd.f32 %v884_v29, %v772_v26  ;;  %1421 = vst [vmem:[%s2420_s3 + $0x60] sm:$0xff] %v1389_v32 }
 0x110   :  { %v998_v33 = vadd.f32 %v997_v30, %v885_v31 }
 0x111   :  { %v661_v35 = vpop.f32.mrf.mxu0  ;;  %v774_v36 = vpop.f32.mrf.mxu1 }
 0x112   :  { %1667 = vmatmul.msk.f32.gmra.mxu2 %vm244_vm8, %v1707_v7  ;;  %v775_v37 = vadd.f32 %v774_v36, %v661_v35  ;;  %1699 = vmatmul.msk.f32.gmra.mxu3 %vm245_vm9, %v1707_v7  ;;  %v1358_v39 = vmul.f32 %v1253_v34, %v998_v33  ;;  %v1283_v34 = vpop.permute.xlu1 %1282 }
 0x114   :  { %1603 = vmatmul.msk.f32.gmra.mxu0 %vm242_vm10, %v1707_v7  ;;  %1635 = vmatmul.msk.f32.gmra.mxu1 %vm243_vm11, %v1707_v7  ;;  %v1390_v43 = vmax.f32 %v1358_v39, 0.0 }
 0x115   :  { %v887_v40 = vpop.f32.mrf.mxu2  ;;  %v1000_v41 = vpop.f32.mrf.mxu3 }
 0x116   :  { %v888_v42 = vadd.f32 %v887_v40, %v775_v37  ;;  %1422 = vst [vmem:[%s2420_s3 + $0x68] sm:$0xff] %v1390_v43 }
 0x118   :  { %v1001_v44 = vadd.f32 %v1000_v41, %v888_v42 }
 0x119   :  { %v664_v58 = vpop.f32.mrf.mxu0  ;;  %v777_v46 = vpop.f32.mrf.mxu1 }
 0x11a   :  { %1668 = vmatmul.msk.f32.gmra.mxu2 %vm248_vm12, %v1707_v7  ;;  %v778_v47 = vadd.f32 %v777_v46, %v664_v58  ;;  %1700 = vmatmul.msk.f32.gmra.mxu3 %vm249_vm13, %v1707_v7  ;;  %v1359_v59 = vmul.f32 %v1258_v45, %v1001_v44  ;;  %v1288_v44 = vpop.permute.xlu2 %1287 }
 0x11c   :  { %1604 = vmatmul.msk.f32.gmra.mxu0 %vm246_vm14, %v1707_v7  ;;  %1636 = vmatmul.msk.f32.gmra.mxu1 %vm247_vm15, %v1707_v7  ;;  %v1391_v50 = vmax.f32 %v1359_v59, 0.0 }
 0x11d   :  { %v890_v60 = vpop.f32.mrf.mxu2  ;;  %v1003_v48 = vpop.f32.mrf.mxu3 }
 0x11e   :  { %v891_v49 = vadd.f32 %v890_v60, %v778_v47  ;;  %1423 = vst [vmem:[%s2420_s3 + $0x70] sm:$0xff] %v1391_v50 }
 0x120   :  { %v1004_v51 = vadd.f32 %v1003_v48, %v891_v49 }
 0x121   :  { %v667_v2 = vpop.f32.mrf.mxu0  ;;  %v780_v52 = vpop.f32.mrf.mxu1 }
 0x122   :  { %v781_v53 = vadd.f32 %v780_v52, %v667_v2  ;;  %v1360_v54 = vmul.f32 %v1263_v1, %v1004_v51  ;;  %v1293_v51 = vpop.permute.xlu0 %1292 }
 0x124   :  { %v1392_v61 = vmax.f32 %v1360_v54, 0.0 }
 0x125   :  { %v893_v55 = vpop.f32.mrf.mxu2  ;;  %v1006_v56 = vpop.f32.mrf.mxu3 }
 0x126   :  { %v894_v57 = vadd.f32 %v893_v55, %v781_v53  ;;  %1424 = vst [vmem:[%s2420_s3 + $0x78] sm:$0xff] %v1392_v61 }
 0x128   :  { %v1007_v7 = vadd.f32 %v1006_v56, %v894_v57 }
 0x129   :  { %v670_v63 = vpop.f32.mrf.mxu0  ;;  %v783_v0 = vpop.f32.mrf.mxu1 }
 0x12a   :  { %v784_v3 = vadd.f32 %v783_v0, %v670_v63  ;;  %v1361_v4 = vmul.f32 %v1268_v62, %v1007_v7  ;;  %v1298_v7 = vpop.permute.xlu1 %1297 }
 0x12c   :  { %v1393_v9 = vmax.f32 %v1361_v4, 0.0 }
 0x12d   :  { %v896_v5 = vpop.f32.mrf.mxu2  ;;  %v1009_v6 = vpop.f32.mrf.mxu3 }
 0x12e   :  { %v897_v8 = vadd.f32 %v896_v5, %v784_v3  ;;  %1425 = vst [vmem:[%s2420_s3 + $0x80] sm:$0xff] %v1393_v9 }
 0x130   :  { %v1010_v10 = vadd.f32 %v1009_v6, %v897_v8 }
 0x131   :  { %v673_v12 = vpop.f32.mrf.mxu0  ;;  %v786_v13 = vpop.f32.mrf.mxu1 }
 0x132   :  { %v787_v14 = vadd.f32 %v786_v13, %v673_v12  ;;  %v1362_v15 = vmul.f32 %v1273_v11, %v1010_v10  ;;  %v1303_v10 = vpop.permute.xlu2 %1302 }
 0x134   :  { %v1394_v19 = vmax.f32 %v1362_v15, 0.0 }
 0x135   :  { %v899_v16 = vpop.f32.mrf.mxu2  ;;  %v1012_v17 = vpop.f32.mrf.mxu3 }
 0x136   :  { %v900_v18 = vadd.f32 %v899_v16, %v787_v14  ;;  %1426 = vst [vmem:[%s2420_s3 + $0x88] sm:$0xff] %v1394_v19 }
 0x138   :  { %v1013_v20 = vadd.f32 %v1012_v17, %v900_v18 }
 0x139   :  { %v676_v21 = vpop.f32.mrf.mxu0  ;;  %v789_v22 = vpop.f32.mrf.mxu1 }
 0x13a   :  { %v790_v23 = vadd.f32 %v789_v22, %v676_v21  ;;  %v1363_v25 = vmul.f32 %v1278_v24, %v1013_v20  ;;  %v1308_v20 = vpop.permute.xlu0 %1307 }
 0x13c   :  { %v1395_v28 = vmax.f32 %v1363_v25, 0.0 }
 0x13d   :  { %v902_v26 = vpop.f32.mrf.mxu2  ;;  %v1015_v27 = vpop.f32.mrf.mxu3 }
 0x13e   :  { %v903_v29 = vadd.f32 %v902_v26, %v790_v23  ;;  %1427 = vst [vmem:[%s2420_s3 + $0x90] sm:$0xff] %v1395_v28 }
 0x140   :  { %v1016_v30 = vadd.f32 %v1015_v27, %v903_v29 }
 0x141   :  { %v679_v31 = vpop.f32.mrf.mxu0  ;;  %v792_v32 = vpop.f32.mrf.mxu1 }
 0x142   :  { %v793_v33 = vadd.f32 %v792_v32, %v679_v31  ;;  %v1364_v35 = vmul.f32 %v1283_v34, %v1016_v30  ;;  %v1313_v30 = vpop.permute.xlu1 %1312 }
 0x144   :  { %v1396_v38 = vmax.f32 %v1364_v35, 0.0 }
 0x145   :  { %v905_v36 = vpop.f32.mrf.mxu2  ;;  %v1018_v37 = vpop.f32.mrf.mxu3 }
 0x146   :  { %v906_v39 = vadd.f32 %v905_v36, %v793_v33  ;;  %1428 = vst [vmem:[%s2420_s3 + $0x98] sm:$0xff] %v1396_v38 }
 0x148   :  { %v1019_v40 = vadd.f32 %v1018_v37, %v906_v39 }
 0x149   :  { %v682_v41 = vpop.f32.mrf.mxu0  ;;  %v795_v42 = vpop.f32.mrf.mxu1 }
 0x14a   :  { %v796_v43 = vadd.f32 %v795_v42, %v682_v41  ;;  %v1365_v45 = vmul.f32 %v1288_v44, %v1019_v40  ;;  %v1318_v40 = vpop.permute.xlu2 %1317 }
 0x14c   :  { %v1397_v47 = vmax.f32 %v1365_v45, 0.0 }
 0x14d   :  { %v908_v58 = vpop.f32.mrf.mxu2  ;;  %v1021_v46 = vpop.f32.mrf.mxu3 }
 0x14e   :  { %v909_v59 = vadd.f32 %v908_v58, %v796_v43  ;;  %1429 = vst [vmem:[%s2420_s3 + $0xa0] sm:$0xff] %v1397_v47 }
 0x150   :  { %v1022_v60 = vadd.f32 %v1021_v46, %v909_v59 }
 0x151   :  { %v685_v48 = vpop.f32.mrf.mxu0  ;;  %v798_v49 = vpop.f32.mrf.mxu1 }
 0x152   :  { %v799_v50 = vadd.f32 %v798_v49, %v685_v48  ;;  %v1366_v1 = vmul.f32 %v1293_v51, %v1022_v60  ;;  %v1323_v60 = vpop.permute.xlu0 %1322 }
 0x154   :  { %v1398_v53 = vmax.f32 %v1366_v1, 0.0 }
 0x155   :  { %v911_v2 = vpop.f32.mrf.mxu2  ;;  %v1024_v52 = vpop.f32.mrf.mxu3 }
 0x156   :  { %v912_v54 = vadd.f32 %v911_v2, %v799_v50  ;;  %1430 = vst [vmem:[%s2420_s3 + $0xa8] sm:$0xff] %v1398_v53 }
 0x158   :  { %v1025_v55 = vadd.f32 %v1024_v52, %v912_v54 }
 0x159   :  { %v688_v56 = vpop.f32.mrf.mxu0  ;;  %v801_v57 = vpop.f32.mrf.mxu1 }
 0x15a   :  { %v802_v61 = vadd.f32 %v801_v57, %v688_v56  ;;  %v1367_v62 = vmul.f32 %v1298_v7, %v1025_v55  ;;  %v1328_v55 = vpop.permute.xlu1 %1327 }
 0x15c   :  { %v1399_v3 = vmax.f32 %v1367_v62, 0.0 }
 0x15d   :  { %v914_v63 = vpop.f32.mrf.mxu2  ;;  %v1027_v0 = vpop.f32.mrf.mxu3 }
 0x15e   :  { %v915_v4 = vadd.f32 %v914_v63, %v802_v61  ;;  %1431 = vst [vmem:[%s2420_s3 + $0xb0] sm:$0xff] %v1399_v3 }
 0x160   :  { %v1028_v5 = vadd.f32 %v1027_v0, %v915_v4 }
 0x161   :  { %v691_v6 = vpop.f32.mrf.mxu0  ;;  %v804_v8 = vpop.f32.mrf.mxu1 }
 0x162   :  { %v805_v9 = vadd.f32 %v804_v8, %v691_v6  ;;  %v1368_v11 = vmul.f32 %v1303_v10, %v1028_v5  ;;  %v1333_v5 = vpop.permute.xlu2 %1332 }
 0x164   :  { %v1400_v14 = vmax.f32 %v1368_v11, 0.0 }
 0x165   :  { %v917_v12 = vpop.f32.mrf.mxu2  ;;  %v1030_v13 = vpop.f32.mrf.mxu3 }
 0x166   :  { %v918_v15 = vadd.f32 %v917_v12, %v805_v9  ;;  %1432 = vst [vmem:[%s2420_s3 + $0xb8] sm:$0xff] %v1400_v14 }
 0x168   :  { %v1031_v16 = vadd.f32 %v1030_v13, %v918_v15 }
 0x169   :  { %v694_v17 = vpop.f32.mrf.mxu0  ;;  %v807_v18 = vpop.f32.mrf.mxu1 }
 0x16a   :  { %v808_v19 = vadd.f32 %v807_v18, %v694_v17  ;;  %v1369_v21 = vmul.f32 %v1308_v20, %v1031_v16  ;;  %v1338_v16 = vpop.permute.xlu0 %1337 }
 0x16c   :  { %v1401_v24 = vmax.f32 %v1369_v21, 0.0 }
 0x16d   :  { %v920_v22 = vpop.f32.mrf.mxu2  ;;  %v1033_v23 = vpop.f32.mrf.mxu3 }
 0x16e   :  { %v921_v25 = vadd.f32 %v920_v22, %v808_v19  ;;  %1433 = vst [vmem:[%s2420_s3 + $0xc0] sm:$0xff] %v1401_v24 }
 0x170   :  { %v1034_v26 = vadd.f32 %v1033_v23, %v921_v25  ;;  %v1343_v23 = vpop.permute.xlu1 %1342 }
 0x171   :  { %v697_v27 = vpop.f32.mrf.mxu0  ;;  %v810_v28 = vpop.f32.mrf.mxu1 }
 0x172   :  { %v811_v29 = vadd.f32 %v810_v28, %v697_v27  ;;  %v1370_v31 = vmul.f32 %v1313_v30, %v1034_v26 }
 0x174   :  { %v1402_v34 = vmax.f32 %v1370_v31, 0.0 }
 0x175   :  { %v923_v32 = vpop.f32.mrf.mxu2  ;;  %v1036_v33 = vpop.f32.mrf.mxu3 }
 0x176   :  { %v924_v35 = vadd.f32 %v923_v32, %v811_v29  ;;  %1434 = vst [vmem:[%s2420_s3 + $0xc8] sm:$0xff] %v1402_v34 }
 0x178   :  { %v1037_v36 = vadd.f32 %v1036_v33, %v924_v35 }
 0x179   :  { %v700_v37 = vpop.f32.mrf.mxu0  ;;  %v813_v38 = vpop.f32.mrf.mxu1 }
 0x17a   :  { %v814_v39 = vadd.f32 %v813_v38, %v700_v37  ;;  %v1371_v41 = vmul.f32 %v1318_v40, %v1037_v36 }
 0x17c   :  { %v1403_v44 = vmax.f32 %v1371_v41, 0.0 }
 0x17d   :  { %v926_v42 = vpop.f32.mrf.mxu2  ;;  %v1039_v43 = vpop.f32.mrf.mxu3 }
 0x17e   :  { %v927_v45 = vadd.f32 %v926_v42, %v814_v39  ;;  %1435 = vst [vmem:[%s2420_s3 + $0xd0] sm:$0xff] %v1403_v44 }
 0x180   :  { %v1040_v58 = vadd.f32 %v1039_v43, %v927_v45 }
 0x181   :  { %v703_v46 = vpop.f32.mrf.mxu0  ;;  %v816_v47 = vpop.f32.mrf.mxu1 }
 0x182   :  { %v817_v59 = vadd.f32 %v816_v47, %v703_v46  ;;  %v1372_v48 = vmul.f32 %v1323_v60, %v1040_v58 }
 0x184   :  { %v1404_v51 = vmax.f32 %v1372_v48, 0.0 }
 0x185   :  { %v929_v49 = vpop.f32.mrf.mxu2  ;;  %v1042_v50 = vpop.f32.mrf.mxu3 }
 0x186   :  { %v930_v1 = vadd.f32 %v929_v49, %v817_v59  ;;  %1436 = vst [vmem:[%s2420_s3 + $0xd8] sm:$0xff] %v1404_v51 }
 0x188   :  { %v1043_v2 = vadd.f32 %v1042_v50, %v930_v1 }
 0x189   :  { %v706_v52 = vpop.f32.mrf.mxu0  ;;  %v819_v53 = vpop.f32.mrf.mxu1 }
 0x18a   :  { %v820_v54 = vadd.f32 %v819_v53, %v706_v52  ;;  %v1373_v56 = vmul.f32 %v1328_v55, %v1043_v2 }
 0x18c   :  { %v1405_v7 = vmax.f32 %v1373_v56, 0.0 }
 0x18d   :  { %v932_v57 = vpop.f32.mrf.mxu2  ;;  %v1045_v61 = vpop.f32.mrf.mxu3 }
 0x18e   :  { %v933_v62 = vadd.f32 %v932_v57, %v820_v54  ;;  %1437 = vst [vmem:[%s2420_s3 + $0xe0] sm:$0xff] %v1405_v7 }
 0x190   :  { %v1046_v63 = vadd.f32 %v1045_v61, %v933_v62 }
 0x191   :  { %v709_v0 = vpop.f32.mrf.mxu0  ;;  %v822_v3 = vpop.f32.mrf.mxu1 }
 0x192   :  { %v823_v4 = vadd.f32 %v822_v3, %v709_v0  ;;  %v1374_v6 = vmul.f32 %v1333_v5, %v1046_v63 }
 0x194   :  { %v1406_v10 = vmax.f32 %v1374_v6, 0.0 }
 0x195   :  { %v935_v8 = vpop.f32.mrf.mxu2  ;;  %v1048_v9 = vpop.f32.mrf.mxu3 }
 0x196   :  { %v936_v11 = vadd.f32 %v935_v8, %v823_v4  ;;  %1438 = vst [vmem:[%s2420_s3 + $0xe8] sm:$0xff] %v1406_v10 }
 0x198   :  { %v1049_v12 = vadd.f32 %v1048_v9, %v936_v11 }
 0x199   :  { %v712_v13 = vpop.f32.mrf.mxu0  ;;  %v825_v14 = vpop.f32.mrf.mxu1 }
 0x19a   :  { %v826_v15 = vadd.f32 %v825_v14, %v712_v13  ;;  %v1375_v17 = vmul.f32 %v1338_v16, %v1049_v12 }
 0x19c   :  { %v1407_v20 = vmax.f32 %v1375_v17, 0.0 }
 0x19d   :  { %v938_v18 = vpop.f32.mrf.mxu2  ;;  %v1051_v19 = vpop.f32.mrf.mxu3 }
 0x19e   :  { %v939_v21 = vadd.f32 %v938_v18, %v826_v15  ;;  %1439 = vst [vmem:[%s2420_s3 + $0xf0] sm:$0xff] %v1407_v20 }
 0x1a0   :  { %v1052_v22 = vadd.f32 %v1051_v19, %v939_v21 }
 0x1a2   :  { %v1376_v24 = vmul.f32 %v1343_v23, %v1052_v22 }
 0x1a4   :  { %v1408_v25 = vmax.f32 %v1376_v24, 0.0 }
 0x1a6   :  { %1440 = vst [vmem:[%s2420_s3 + $0xf8] sm:$0xff] %v1408_v25 }

// kernel: gcn_forward.2
= control target key start
LH: loop header
LB: loop body
LE: loop exit
PB: predicated region body
PF: predicated region fallthrough
CT: control target
= control target key end

     0   :  { %v1666_v0 = vmov 0   ;;  %s2424_s0 = inlined_call_operand.vmem [shape: s32[512,1], index: 0, kind: input, shape index: {}]   ;;  %s2425_s1 = inlined_call_operand.vmem [shape: f32[256,128], index: 1, kind: input, shape index: {}]   ;;  %s2426_s2 = inlined_call_operand.vmem [shape: f32[512,128], index: 2, kind: output, shape index: {}]  }
   0x1   :  { %1665 = vset.pattern.permute.xlu2 %v1666_v0  ;;  %1664 = vset.pattern.permute.xlu1 %v1666_v0  ;;  %v120_v1 = vld [vmem:[%s2424_s0 + $0x110] sm:$0xff]  ;;  %v119_v2 = vld [vmem:[%s2424_s0 + $0x108] sm:$0xff]  ;;  %v118_v3 = vld [vmem:[%s2424_s0 + $0x100] sm:$0xff] }
   0x2   :  { %1663 = vset.pattern.permute.xlu0 %v1666_v0  ;;  %253 = vperm.xlu2 %1665, %v120_v1   ;;  %v88_v4 = vld [vmem:[%s2424_s0 + $0x10] sm:$0xff]  ;;  %v87_v5 = vld [vmem:[%s2424_s0 + $0x8] sm:$0xff]  ;;  %v86_v6 = vld [vmem:[%s2424_s0] sm:$0xff] }
   0x3   :  { %250 = vperm.xlu1 %1664, %v119_v2   ;;  %247 = vperm.xlu0 %1663, %v118_v3   ;;  %v122_v7 = vld [vmem:[%s2424_s0 + $0x120] sm:$0xff]  ;;  %v89_v8 = vld [vmem:[%s2424_s0 + $0x18] sm:$0xff]  ;;  %v91_v10 = vld [vmem:[%s2424_s0 + $0x28] sm:$0xff] }
   0x4   :  { %v121_v9 = vld [vmem:[%s2424_s0 + $0x118] sm:$0xff]  ;;  %v123_v11 = vld [vmem:[%s2424_s0 + $0x128] sm:$0xff]  ;;  %v90_v12 = vld [vmem:[%s2424_s0 + $0x20] sm:$0xff] }
   0x5   :  { %v125_v13 = vld [vmem:[%s2424_s0 + $0x138] sm:$0xff]  ;;  %v92_v14 = vld [vmem:[%s2424_s0 + $0x30] sm:$0xff]  ;;  %v94_v16 = vld [vmem:[%s2424_s0 + $0x40] sm:$0xff] }
   0x6   :  { %v124_v15 = vld [vmem:[%s2424_s0 + $0x130] sm:$0xff]  ;;  %v126_v17 = vld [vmem:[%s2424_s0 + $0x140] sm:$0xff]  ;;  %v93_v18 = vld [vmem:[%s2424_s0 + $0x38] sm:$0xff] }
   0x7   :  { %v128_v19 = vld [vmem:[%s2424_s0 + $0x150] sm:$0xff]  ;;  %v95_v20 = vld [vmem:[%s2424_s0 + $0x48] sm:$0xff]  ;;  %v805_v22 = vld [vmem:[%s2425_s1 + $0x78] sm:$0xff] }
   0x8   :  { %v127_v21 = vld [vmem:[%s2424_s0 + $0x148] sm:$0xff]  ;;  %v821_v23 = vld [vmem:[%s2425_s1 + $0xf8] sm:$0xff]  ;;  %v804_v24 = vld [vmem:[%s2425_s1 + $0x70] sm:$0xff]  ;;  %1628 = vmatpush.msra.mxu2 %v805_v22  ;;  %822 = vmatpush.msra.mxu0 %v805_v22 }
   0x9   :  { %1644 = vmatpush.msra.mxu3 %v821_v23  ;;  %v820_v25 = vld [vmem:[%s2425_s1 + $0xf0] sm:$0xff]  ;;  %1031 = vmatpush.msra.mxu1 %v821_v23  ;;  %v97_v26 = vld [vmem:[%s2424_s0 + $0x58] sm:$0xff]  ;;  %v803_v29 = vld [vmem:[%s2425_s1 + $0x68] sm:$0xff] }
   0xa   :  { %157 = vperm.xlu2 %1665, %v88_v4   ;;  %1629 = vmatpush.msra.mxu2 %v804_v24  ;;  %v129_v27 = vld [vmem:[%s2424_s0 + $0x158] sm:$0xff]  ;;  %v96_v28 = vld [vmem:[%s2424_s0 + $0x50] sm:$0xff]  ;;  %v819_v30 = vld [vmem:[%s2425_s1 + $0xe8] sm:$0xff] }
   0xb   :  { %154 = vperm.xlu1 %1664, %v87_v5   ;;  %151 = vperm.xlu0 %1663, %v86_v6   ;;  %v802_v31 = vld [vmem:[%s2425_s1 + $0x60] sm:$0xff]  ;;  %v801_v33 = vld [vmem:[%s2425_s1 + $0x58] sm:$0xff]  ;;  %v131_v35 = vld [vmem:[%s2424_s0 + $0x168] sm:$0xff] }
   0xc   :  { %1645 = vmatpush.msra.mxu3 %v820_v25  ;;  %823 = vmatpush.msra.mxu0 %v804_v24  ;;  %v818_v32 = vld [vmem:[%s2425_s1 + $0xe0] sm:$0xff]  ;;  %v817_v34 = vld [vmem:[%s2425_s1 + $0xd8] sm:$0xff]  ;;  %v800_v36 = vld [vmem:[%s2425_s1 + $0x50] sm:$0xff] }
   0xd   :  { %1032 = vmatpush.msra.mxu1 %v820_v25  ;;  %1630 = vmatpush.msra.mxu2 %v803_v29  ;;  %v98_v37 = vld [vmem:[%s2424_s0 + $0x60] sm:$0xff]  ;;  %v816_v39 = vld [vmem:[%s2425_s1 + $0xd0] sm:$0xff]  ;;  %v799_v40 = vld [vmem:[%s2425_s1 + $0x48] sm:$0xff] }
   0xe   :  { %1646 = vmatpush.msra.mxu3 %v819_v30  ;;  %824 = vmatpush.msra.mxu0 %v803_v29  ;;  %v130_v38 = vld [vmem:[%s2424_s0 + $0x160] sm:$0xff]  ;;  %v815_v41 = vld [vmem:[%s2425_s1 + $0xc8] sm:$0xff]  ;;  %v797_v44 = vld [vmem:[%s2425_s1 + $0x38] sm:$0xff] }
   0xf   :  { %1033 = vmatpush.msra.mxu1 %v819_v30  ;;  %1631 = vmatpush.msra.mxu2 %v802_v31  ;;  %v798_v42 = vld [vmem:[%s2425_s1 + $0x40] sm:$0xff]  ;;  %v100_v45 = vld [vmem:[%s2424_s0 + $0x70] sm:$0xff]  ;;  %v813_v46 = vld [vmem:[%s2425_s1 + $0xb8] sm:$0xff] }
  0x10   :  { %1647 = vmatpush.msra.mxu3 %v818_v32  ;;  %825 = vmatpush.msra.mxu0 %v802_v31  ;;  %v814_v43 = vld [vmem:[%s2425_s1 + $0xc0] sm:$0xff]  ;;  %v132_v47 = vld [vmem:[%s2424_s0 + $0x170] sm:$0xff]  ;;  %v99_v48 = vld [vmem:[%s2424_s0 + $0x68] sm:$0xff] }
  0x11   :  { %1034 = vmatpush.msra.mxu1 %v818_v32  ;;  %1632 = vmatpush.msra.mxu2 %v801_v33  ;;  %v796_v49 = vld [vmem:[%s2425_s1 + $0x30] sm:$0xff]  ;;  %v795_v51 = vld [vmem:[%s2425_s1 + $0x28] sm:$0xff]  ;;  %v794_v53 = vld [vmem:[%s2425_s1 + $0x20] sm:$0xff] }
  0x12   :  { %259 = vperm.xlu2 %1665, %v122_v7   ;;  %1648 = vmatpush.msra.mxu3 %v817_v34  ;;  %v812_v50 = vld [vmem:[%s2425_s1 + $0xb0] sm:$0xff]  ;;  %v811_v52 = vld [vmem:[%s2425_s1 + $0xa8] sm:$0xff]  ;;  %v810_v54 = vld [vmem:[%s2425_s1 + $0xa0] sm:$0xff] }
  0x13   :  { %160 = vperm.xlu1 %1664, %v89_v8   ;;  %256 = vperm.xlu0 %1663, %v121_v9   ;;  %v134_v55 = vld [vmem:[%s2424_s0 + $0x180] sm:$0xff]  ;;  %v793_v56 = vld [vmem:[%s2425_s1 + $0x18] sm:$0xff]  ;;  %v792_v60 = vld [vmem:[%s2425_s1 + $0x10] sm:$0xff] }
  0x14   :  { %826 = vmatpush.msra.mxu0 %v801_v33  ;;  %1035 = vmatpush.msra.mxu1 %v817_v34  ;;  %v101_v57 = vld [vmem:[%s2424_s0 + $0x78] sm:$0xff]  ;;  %v808_v61 = vld [vmem:[%s2425_s1 + $0x90] sm:$0xff]  ;;  %v791_v62 = vld [vmem:[%s2425_s1 + $0x8] sm:$0xff] }
  0x15   :  { %1633 = vmatpush.msra.mxu2 %v800_v36  ;;  %1649 = vmatpush.msra.mxu3 %v816_v39  ;;  %v133_v58 = vld [vmem:[%s2424_s0 + $0x178] sm:$0xff]  ;;  %v807_v63 = vld [vmem:[%s2425_s1 + $0x88] sm:$0xff]  ;;  %v790_v0 = vld [vmem:[%s2425_s1] sm:$0xff] }
  0x16   :  { %827 = vmatpush.msra.mxu0 %v800_v36  ;;  %1036 = vmatpush.msra.mxu1 %v816_v39  ;;  %v809_v59 = vld [vmem:[%s2425_s1 + $0x98] sm:$0xff]  ;;  %v103_v1 = vld [vmem:[%s2424_s0 + $0x88] sm:$0xff]  ;;  %v806_v2 = vld [vmem:[%s2425_s1 + $0x80] sm:$0xff] }
  0x17   :  { %1634 = vmatpush.msra.mxu2 %v799_v40  ;;  %1650 = vmatpush.msra.mxu3 %v815_v41  ;;  %v135_v3 = vld [vmem:[%s2424_s0 + $0x188] sm:$0xff]  ;;  %v102_v4 = vld [vmem:[%s2424_s0 + $0x80] sm:$0xff]  ;;  %v137_v5 = vld [vmem:[%s2424_s0 + $0x198] sm:$0xff] }
  0x18   :  { %828 = vmatpush.msra.mxu0 %v799_v40  ;;  %1037 = vmatpush.msra.mxu1 %v815_v41  ;;  %v104_v6 = vld [vmem:[%s2424_s0 + $0x90] sm:$0xff]  ;;  %v106_v8 = vld [vmem:[%s2424_s0 + $0xa0] sm:$0xff]  ;;  %v143_v24 = vld [vmem:[%s2424_s0 + $0x1c8] sm:$0xff] }
  0x19   :  { %1635 = vmatpush.msra.mxu2 %v798_v42  ;;  %1651 = vmatpush.msra.mxu3 %v814_v43  ;;  %v136_v7 = vld [vmem:[%s2424_s0 + $0x190] sm:$0xff]  ;;  %v138_v9 = vld [vmem:[%s2424_s0 + $0x1a0] sm:$0xff]  ;;  %v111_v31 = vld [vmem:[%s2424_s0 + $0xc8] sm:$0xff] }
  0x1a   :  { %166 = vperm.xlu2 %1665, %v91_v10   ;;  %829 = vmatpush.msra.mxu0 %v798_v42  ;;  %v105_v10 = vld [vmem:[%s2424_s0 + $0x98] sm:$0xff]  ;;  %v110_v25 = vld [vmem:[%s2424_s0 + $0xc0] sm:$0xff]  ;;  %v112_v29 = vld [vmem:[%s2424_s0 + $0xd0] sm:$0xff] }
  0x1b   :  { %262 = vperm.xlu1 %1664, %v123_v11   ;;  %163 = vperm.xlu0 %1663, %v90_v12   ;;  %v80_v11 = vlaneseq  ;;  %v144_v30 = vld [vmem:[%s2424_s0 + $0x1d0] sm:$0xff]  ;;  %v146_v34 = vld [vmem:[%s2424_s0 + $0x1e0] sm:$0xff]  ;;  %v145_v36 = vld [vmem:[%s2424_s0 + $0x1d8] sm:$0xff] }
  0x1c   :  { %1636 = vmatpush.msra.mxu2 %v797_v44  ;;  %1038 = vmatpush.msra.mxu1 %v814_v43  ;;  %v115_v39 = vld [vmem:[%s2424_s0 + $0xe8] sm:$0xff]  ;;  %v114_v41 = vld [vmem:[%s2424_s0 + $0xe0] sm:$0xff] }
  0x1d   :  { %1652 = vmatpush.msra.mxu3 %v813_v46  ;;  %830 = vmatpush.msra.mxu0 %v797_v44  ;;  %v1905_v12 = vand.u32 127, %v80_v11  ;;  %v147_v40 = vld [vmem:[%s2424_s0 + $0x1e8] sm:$0xff]  ;;  %v149_v44 = vld [vmem:[%s2424_s0 + $0x1f8] sm:$0xff] }
  0x1e   :  { %1637 = vmatpush.msra.mxu2 %v796_v49  ;;  %1039 = vmatpush.msra.mxu1 %v813_v46  ;;  %v148_v46 = vld [vmem:[%s2424_s0 + $0x1f0] sm:$0xff] }
  0x1f   :  { %1653 = vmatpush.msra.mxu3 %v812_v50  ;;  %831 = vmatpush.msra.mxu0 %v796_v49  ;;  %v117_v49 = vld [vmem:[%s2424_s0 + $0xf8] sm:$0xff] }
  0x20   :  { %1638 = vmatpush.msra.mxu2 %v795_v51  ;;  %1040 = vmatpush.msra.mxu1 %v812_v50 }
  0x21   :  { %1654 = vmatpush.msra.mxu3 %v811_v52  ;;  %832 = vmatpush.msra.mxu0 %v795_v51 }
  0x22   :  { %268 = vperm.xlu2 %1665, %v125_v13   ;;  %1639 = vmatpush.msra.mxu2 %v794_v53  ;;  %v140_v13 = vld [vmem:[%s2424_s0 + $0x1b0] sm:$0xff] }
  0x23   :  { %169 = vperm.xlu1 %1664, %v92_v14   ;;  %265 = vperm.xlu0 %1663, %v124_v15   ;;  %v107_v14 = vld [vmem:[%s2424_s0 + $0xa8] sm:$0xff] }
  0x24   :  { %1655 = vmatpush.msra.mxu3 %v810_v54  ;;  %1041 = vmatpush.msra.mxu1 %v811_v52  ;;  %v139_v15 = vld [vmem:[%s2424_s0 + $0x1a8] sm:$0xff] }
  0x25   :  { %1640 = vmatpush.msra.mxu2 %v793_v56  ;;  %833 = vmatpush.msra.mxu0 %v794_v53 }
  0x26   :  { %1656 = vmatpush.msra.mxu3 %v809_v59  ;;  %1042 = vmatpush.msra.mxu1 %v810_v54 }
  0x27   :  { %1641 = vmatpush.msra.mxu2 %v792_v60  ;;  %834 = vmatpush.msra.mxu0 %v793_v56 }
  0x28   :  { %1657 = vmatpush.msra.mxu3 %v808_v61  ;;  %1043 = vmatpush.msra.mxu1 %v809_v59 }
  0x29   :  { %1642 = vmatpush.msra.mxu2 %v791_v62  ;;  %835 = vmatpush.msra.mxu0 %v792_v60 }
  0x2a   :  { %175 = vperm.xlu2 %1665, %v94_v16   ;;  %1658 = vmatpush.msra.mxu3 %v807_v63  ;;  %v1917_v16 = vadd.s32 128, %v1905_v12 }
  0x2b   :  { %271 = vperm.xlu1 %1664, %v126_v17   ;;  %172 = vperm.xlu0 %1663, %v93_v18   ;;  %v1667_v18 = vmov 1.0  }
  0x2c   :  { %1643 = vmatpush.msra.mxu2 %v790_v0  ;;  %1044 = vmatpush.msra.mxu1 %v808_v61 }
  0x2d   :  { %1659 = vmatpush.msra.mxu3 %v806_v2  ;;  %836 = vmatpush.msra.mxu0 %v791_v62 }
  0x2e   :  { %1045 = vmatpush.msra.mxu1 %v807_v63 }
  0x2f   :  { %837 = vmatpush.msra.mxu0 %v790_v0 }
  0x30   :  { %1046 = vmatpush.msra.mxu1 %v806_v2 }
  0x32   :  { %277 = vperm.xlu2 %1665, %v128_v19   ;;  %v109_v19 = vld [vmem:[%s2424_s0 + $0xb8] sm:$0xff] }
  0x33   :  { %178 = vperm.xlu1 %1664, %v95_v20   ;;  %274 = vperm.xlu0 %1663, %v127_v21   ;;  %v141_v20 = vld [vmem:[%s2424_s0 + $0x1b8] sm:$0xff]  ;;  %v108_v21 = vld [vmem:[%s2424_s0 + $0xb0] sm:$0xff] }
  0x3a   :  { %184 = vperm.xlu2 %1665, %v97_v26   ;;  %v142_v26 = vld [vmem:[%s2424_s0 + $0x1c0] sm:$0xff] }
  0x3b   :  { %280 = vperm.xlu1 %1664, %v129_v27   ;;  %181 = vperm.xlu0 %1663, %v96_v28  }
  0x42   :  { %286 = vperm.xlu2 %1665, %v131_v35   ;;  %v113_v35 = vld [vmem:[%s2424_s0 + $0xd8] sm:$0xff] }
  0x43   :  { %187 = vperm.xlu1 %1664, %v98_v37   ;;  %283 = vperm.xlu0 %1663, %v130_v38  }
  0x4a   :  { %193 = vperm.xlu2 %1665, %v100_v45   ;;  %v116_v45 = vld [vmem:[%s2424_s0 + $0xf0] sm:$0xff] }
  0x4b   :  { %289 = vperm.xlu1 %1664, %v132_v47   ;;  %190 = vperm.xlu0 %1663, %v99_v48  }
  0x52   :  { %295 = vperm.xlu2 %1665, %v134_v55  }
  0x53   :  { %196 = vperm.xlu1 %1664, %v101_v57   ;;  %292 = vperm.xlu0 %1663, %v133_v58  }
  0x5a   :  { %202 = vperm.xlu2 %1665, %v103_v1  }
  0x5b   :  { %298 = vperm.xlu1 %1664, %v135_v3   ;;  %199 = vperm.xlu0 %1663, %v102_v4  }
  0x5c   :  { %v254_v27 = vpop.permute.xlu2 %253 }
  0x5d   :  { %vm410_vm6 = vcmp.eq.s32.totalorder %v254_v27, %v1905_v12  ;;  %vm411_vm7 = vcmp.eq.s32.totalorder %v254_v27, %v1917_v16 }
  0x62   :  { %304 = vperm.xlu2 %1665, %v137_v5  }
  0x63   :  { %205 = vperm.xlu1 %1664, %v104_v6   ;;  %301 = vperm.xlu0 %1663, %v136_v7  }
  0x64   :  { %v158_v32 = vpop.permute.xlu2 %157 }
  0x65   :  { %vm346_vm10 = vcmp.eq.s32.totalorder %v158_v32, %v1905_v12  ;;  %vm347_vm12 = vcmp.eq.s32.totalorder %v158_v32, %v1917_v16 }
  0x6a   :  { %211 = vperm.xlu2 %1665, %v106_v8  }
  0x6b   :  { %307 = vperm.xlu1 %1664, %v138_v9   ;;  %208 = vperm.xlu0 %1663, %v105_v10  }
  0x6c   :  { %v260_v38 = vpop.permute.xlu2 %259 }
  0x6d   :  { %vm414_vm15 = vcmp.eq.s32.totalorder %v260_v38, %v1905_v12 }
  0x72   :  { %313 = vperm.xlu2 %1665, %v140_v13  }
  0x73   :  { %214 = vperm.xlu1 %1664, %v107_v14   ;;  %310 = vperm.xlu0 %1663, %v139_v15  }
  0x74   :  { %v167_v47 = vpop.permute.xlu2 %166 }
  0x75   :  { %v248_v17 = vpop.permute.xlu0 %247  ;;  %v251_v22 = vpop.permute.xlu1 %250 }
  0x76   :  { %vm406_vm0 = vcmp.eq.s32.totalorder %v248_v17, %v1905_v12  ;;  %vm407_vm1 = vcmp.eq.s32.totalorder %v248_v17, %v1917_v16  ;;  %vm408_vm2 = vcmp.eq.s32.totalorder %v251_v22, %v1905_v12  ;;  %vm409_vm3 = vcmp.eq.s32.totalorder %v251_v22, %v1917_v16 }
  0x77   :  { %1532 = vmatmul.msk.f32.vlgmr.msra.gmra.mxu2 %vm406_vm0, %v1667_v18  ;;  %1596 = vmatmul.msk.f32.vlgmr.msra.gmra.mxu3 %vm407_vm1, %v1667_v18  ;;  %vm415_vm1 = vcmp.eq.s32.totalorder %v260_v38, %v1917_v16 }
  0x7a   :  { %220 = vperm.xlu2 %1665, %v109_v19  }
  0x7b   :  { %316 = vperm.xlu1 %1664, %v141_v20   ;;  %217 = vperm.xlu0 %1663, %v108_v21  }
  0x7c   :  { %v269_v51 = vpop.permute.xlu2 %268 }
  0x7d   :  { %v152_v23 = vpop.permute.xlu0 %151  ;;  %v155_v28 = vpop.permute.xlu1 %154 }
  0x7e   :  { %vm342_vm4 = vcmp.eq.s32.totalorder %v152_v23, %v1905_v12  ;;  %vm343_vm5 = vcmp.eq.s32.totalorder %v152_v23, %v1917_v16  ;;  %vm344_vm8 = vcmp.eq.s32.totalorder %v155_v28, %v1905_v12  ;;  %vm345_vm9 = vcmp.eq.s32.totalorder %v155_v28, %v1917_v16 }
  0x7f   :  { %1500 = vmatmul.msk.f32.vlgmr.msra.gmra.mxu0 %vm342_vm4, %v1667_v18  ;;  %1533 = vmatmul.msk.f32.gmra.mxu2 %vm408_vm2, %v1667_v18 }
  0x80   :  { %1564 = vmatmul.msk.f32.vlgmr.msra.gmra.mxu1 %vm343_vm5, %v1667_v18  ;;  %1597 = vmatmul.msk.f32.gmra.mxu3 %vm409_vm3, %v1667_v18 }
  0x82   :  { %322 = vperm.xlu2 %1665, %v143_v24  }
  0x83   :  { %223 = vperm.xlu1 %1664, %v110_v25   ;;  %319 = vperm.xlu0 %1663, %v142_v26  }
  0x84   :  { %v176_v54 = vpop.permute.xlu2 %175 }
  0x85   :  { %v257_v33 = vpop.permute.xlu0 %256  ;;  %v161_v37 = vpop.permute.xlu1 %160 }
  0x86   :  { %vm412_vm11 = vcmp.eq.s32.totalorder %v257_v33, %v1905_v12  ;;  %vm413_vm13 = vcmp.eq.s32.totalorder %v257_v33, %v1917_v16  ;;  %vm348_vm14 = vcmp.eq.s32.totalorder %v161_v37, %v1905_v12  ;;  %vm349_vm0 = vcmp.eq.s32.totalorder %v161_v37, %v1917_v16 }
  0x87   :  { %1501 = vmatmul.msk.f32.gmra.mxu0 %vm344_vm8, %v1667_v18  ;;  %1534 = vmatmul.msk.f32.gmra.mxu2 %vm410_vm6, %v1667_v18  ;;  %vm352_vm6 = vcmp.eq.s32.totalorder %v167_v47, %v1905_v12  ;;  %vm353_vm8 = vcmp.eq.s32.totalorder %v167_v47, %v1917_v16 }
  0x88   :  { %1565 = vmatmul.msk.f32.gmra.mxu1 %vm345_vm9, %v1667_v18  ;;  %1598 = vmatmul.msk.f32.gmra.mxu3 %vm411_vm7, %v1667_v18 }
  0x8a   :  { %229 = vperm.xlu2 %1665, %v112_v29  }
  0x8b   :  { %325 = vperm.xlu1 %1664, %v144_v30   ;;  %226 = vperm.xlu0 %1663, %v111_v31  }
  0x8c   :  { %v278_v57 = vpop.permute.xlu2 %277 }
  0x8d   :  { %v164_v42 = vpop.permute.xlu0 %163  ;;  %v263_v43 = vpop.permute.xlu1 %262 }
  0x8e   :  { %vm350_vm2 = vcmp.eq.s32.totalorder %v164_v42, %v1905_v12  ;;  %vm416_vm3 = vcmp.eq.s32.totalorder %v263_v43, %v1905_v12  ;;  %vm351_vm4 = vcmp.eq.s32.totalorder %v164_v42, %v1917_v16  ;;  %vm417_vm5 = vcmp.eq.s32.totalorder %v263_v43, %v1917_v16 }
  0x8f   :  { %1502 = vmatmul.msk.f32.gmra.mxu0 %vm346_vm10, %v1667_v18  ;;  %1535 = vmatmul.msk.f32.gmra.mxu2 %vm412_vm11, %v1667_v18  ;;  %vm420_vm11 = vcmp.eq.s32.totalorder %v269_v51, %v1905_v12 }
  0x90   :  { %1566 = vmatmul.msk.f32.gmra.mxu1 %vm347_vm12, %v1667_v18  ;;  %1599 = vmatmul.msk.f32.gmra.mxu3 %vm413_vm13, %v1667_v18  ;;  %vm421_vm13 = vcmp.eq.s32.totalorder %v269_v51, %v1917_v16 }
  0x92   :  { %331 = vperm.xlu2 %1665, %v146_v34  }
  0x93   :  { %232 = vperm.xlu1 %1664, %v113_v35   ;;  %328 = vperm.xlu0 %1663, %v145_v36  }
  0x94   :  { %v185_v60 = vpop.permute.xlu2 %184 }
  0x95   :  { %v266_v48 = vpop.permute.xlu0 %265  ;;  %v170_v50 = vpop.permute.xlu1 %169 }
  0x96   :  { %vm418_vm7 = vcmp.eq.s32.totalorder %v266_v48, %v1905_v12  ;;  %vm419_vm9 = vcmp.eq.s32.totalorder %v266_v48, %v1917_v16  ;;  %vm354_vm10 = vcmp.eq.s32.totalorder %v170_v50, %v1905_v12  ;;  %vm355_vm12 = vcmp.eq.s32.totalorder %v170_v50, %v1917_v16 }
  0x97   :  { %1503 = vmatmul.msk.f32.gmra.mxu0 %vm348_vm14, %v1667_v18  ;;  %1536 = vmatmul.msk.f32.gmra.mxu2 %vm414_vm15, %v1667_v18 }
  0x98   :  { %1567 = vmatmul.msk.f32.gmra.mxu1 %vm349_vm0, %v1667_v18  ;;  %1600 = vmatmul.msk.f32.gmra.mxu3 %vm415_vm1, %v1667_v18 }
  0x9a   :  { %238 = vperm.xlu2 %1665, %v115_v39  }
  0x9b   :  { %334 = vperm.xlu1 %1664, %v147_v40   ;;  %235 = vperm.xlu0 %1663, %v114_v41  }
  0x9c   :  { %v287_v63 = vpop.permute.xlu2 %286 }
  0x9d   :  { %v173_v52 = vpop.permute.xlu0 %172  ;;  %v272_v53 = vpop.permute.xlu1 %271 }
  0x9e   :  { %vm356_vm14 = vcmp.eq.s32.totalorder %v173_v52, %v1905_v12  ;;  %vm422_vm15 = vcmp.eq.s32.totalorder %v272_v53, %v1905_v12  ;;  %vm357_vm0 = vcmp.eq.s32.totalorder %v173_v52, %v1917_v16  ;;  %vm423_vm1 = vcmp.eq.s32.totalorder %v272_v53, %v1917_v16 }
  0x9f   :  { %1504 = vmatmul.msk.f32.gmra.mxu0 %vm350_vm2, %v1667_v18  ;;  %1537 = vmatmul.msk.f32.gmra.mxu2 %vm416_vm3, %v1667_v18  ;;  %vm358_vm2 = vcmp.eq.s32.totalorder %v176_v54, %v1905_v12 }
  0xa0   :  { %1568 = vmatmul.msk.f32.gmra.mxu1 %vm351_vm4, %v1667_v18  ;;  %1601 = vmatmul.msk.f32.gmra.mxu3 %vm417_vm5, %v1667_v18  ;;  %vm359_vm4 = vcmp.eq.s32.totalorder %v176_v54, %v1917_v16 }
  0xa2   :  { %340 = vperm.xlu2 %1665, %v149_v44  }
  0xa3   :  { %241 = vperm.xlu1 %1664, %v116_v45   ;;  %337 = vperm.xlu0 %1663, %v148_v46  }
  0xa4   :  { %v194_v2 = vpop.permute.xlu2 %193 }
  0xa5   :  { %v275_v55 = vpop.permute.xlu0 %274  ;;  %v179_v56 = vpop.permute.xlu1 %178 }
  0xa6   :  { %vm424_vm3 = vcmp.eq.s32.totalorder %v275_v55, %v1905_v12  ;;  %vm425_vm5 = vcmp.eq.s32.totalorder %v275_v55, %v1917_v16 }
  0xa7   :  { %1505 = vmatmul.msk.f32.gmra.mxu0 %vm352_vm6, %v1667_v18  ;;  %1538 = vmatmul.msk.f32.gmra.mxu2 %vm418_vm7, %v1667_v18  ;;  %vm360_vm6 = vcmp.eq.s32.totalorder %v179_v56, %v1905_v12  ;;  %vm426_vm7 = vcmp.eq.s32.totalorder %v278_v57, %v1905_v12 }
  0xa8   :  { %1569 = vmatmul.msk.f32.gmra.mxu1 %vm353_vm8, %v1667_v18  ;;  %1602 = vmatmul.msk.f32.gmra.mxu3 %vm419_vm9, %v1667_v18  ;;  %vm361_vm8 = vcmp.eq.s32.totalorder %v179_v56, %v1917_v16  ;;  %vm427_vm9 = vcmp.eq.s32.totalorder %v278_v57, %v1917_v16 }
  0xab   :  { %244 = vperm.xlu0 %1663, %v117_v49  }
  0xac   :  { %v296_v5 = vpop.permute.xlu2 %295 }
  0xad   :  { %v182_v58 = vpop.permute.xlu0 %181  ;;  %v281_v59 = vpop.permute.xlu1 %280 }
  0xaf   :  { %1506 = vmatmul.msk.f32.gmra.mxu0 %vm354_vm10, %v1667_v18  ;;  %1539 = vmatmul.msk.f32.gmra.mxu2 %vm420_vm11, %v1667_v18  ;;  %vm362_vm10 = vcmp.eq.s32.totalorder %v182_v58, %v1905_v12  ;;  %vm428_vm11 = vcmp.eq.s32.totalorder %v281_v59, %v1905_v12 }
  0xb0   :  { %1570 = vmatmul.msk.f32.gmra.mxu1 %vm355_vm12, %v1667_v18  ;;  %1603 = vmatmul.msk.f32.gmra.mxu3 %vm421_vm13, %v1667_v18  ;;  %vm363_vm12 = vcmp.eq.s32.totalorder %v182_v58, %v1917_v16  ;;  %vm429_vm13 = vcmp.eq.s32.totalorder %v281_v59, %v1917_v16 }
  0xb4   :  { %v203_v15 = vpop.permute.xlu2 %202 }
  0xb5   :  { %v284_v61 = vpop.permute.xlu0 %283  ;;  %v188_v62 = vpop.permute.xlu1 %187 }
  0xb7   :  { %1507 = vmatmul.msk.f32.gmra.mxu0 %vm356_vm14, %v1667_v18  ;;  %1540 = vmatmul.msk.f32.gmra.mxu2 %vm422_vm15, %v1667_v18  ;;  %vm364_vm14 = vcmp.eq.s32.totalorder %v185_v60, %v1905_v12  ;;  %vm430_vm15 = vcmp.eq.s32.totalorder %v284_v61, %v1905_v12 }
  0xb8   :  { %1571 = vmatmul.msk.f32.gmra.mxu1 %vm357_vm0, %v1667_v18  ;;  %1604 = vmatmul.msk.f32.gmra.mxu3 %vm423_vm1, %v1667_v18  ;;  %vm365_vm0 = vcmp.eq.s32.totalorder %v185_v60, %v1917_v16  ;;  %vm431_vm1 = vcmp.eq.s32.totalorder %v284_v61, %v1917_v16 }
  0xbc   :  { %v305_v27 = vpop.permute.xlu2 %304 }
  0xbd   :  { %v191_v0 = vpop.permute.xlu0 %190  ;;  %v290_v1 = vpop.permute.xlu1 %289 }
  0xbf   :  { %1508 = vmatmul.msk.f32.gmra.mxu0 %vm358_vm2, %v1667_v18  ;;  %1541 = vmatmul.msk.f32.gmra.mxu2 %vm424_vm3, %v1667_v18  ;;  %vm366_vm2 = vcmp.eq.s32.totalorder %v188_v62, %v1905_v12  ;;  %vm432_vm3 = vcmp.eq.s32.totalorder %v287_v63, %v1905_v12 }
  0xc0   :  { %1572 = vmatmul.msk.f32.gmra.mxu1 %vm359_vm4, %v1667_v18  ;;  %1605 = vmatmul.msk.f32.gmra.mxu3 %vm425_vm5, %v1667_v18  ;;  %vm367_vm4 = vcmp.eq.s32.totalorder %v188_v62, %v1917_v16  ;;  %vm433_vm5 = vcmp.eq.s32.totalorder %v287_v63, %v1917_v16 }
  0xc4   :  { %v212_v41 = vpop.permute.xlu2 %211 }
  0xc5   :  { %v293_v3 = vpop.permute.xlu0 %292  ;;  %v197_v4 = vpop.permute.xlu1 %196 }
  0xc7   :  { %1509 = vmatmul.msk.f32.gmra.mxu0 %vm360_vm6, %v1667_v18  ;;  %1542 = vmatmul.msk.f32.gmra.mxu2 %vm426_vm7, %v1667_v18  ;;  %vm368_vm6 = vcmp.eq.s32.totalorder %v191_v0, %v1905_v12  ;;  %vm434_vm7 = vcmp.eq.s32.totalorder %v290_v1, %v1905_v12 }
  0xc8   :  { %1573 = vmatmul.msk.f32.gmra.mxu1 %vm361_vm8, %v1667_v18  ;;  %1606 = vmatmul.msk.f32.gmra.mxu3 %vm427_vm9, %v1667_v18  ;;  %vm369_vm8 = vcmp.eq.s32.totalorder %v191_v0, %v1917_v16  ;;  %vm435_vm9 = vcmp.eq.s32.totalorder %v290_v1, %v1917_v16 }
  0xcc   :  { %v314_v51 = vpop.permute.xlu2 %313 }
  0xcd   :  { %v200_v6 = vpop.permute.xlu0 %199  ;;  %v299_v9 = vpop.permute.xlu1 %298 }
  0xcf   :  { %1510 = vmatmul.msk.f32.gmra.mxu0 %vm362_vm10, %v1667_v18  ;;  %1543 = vmatmul.msk.f32.gmra.mxu2 %vm428_vm11, %v1667_v18  ;;  %vm370_vm10 = vcmp.eq.s32.totalorder %v194_v2, %v1905_v12  ;;  %vm436_vm11 = vcmp.eq.s32.totalorder %v293_v3, %v1905_v12 }
  0xd0   :  { %1574 = vmatmul.msk.f32.gmra.mxu1 %vm363_vm12, %v1667_v18  ;;  %1607 = vmatmul.msk.f32.gmra.mxu3 %vm429_vm13, %v1667_v18  ;;  %vm371_vm12 = vcmp.eq.s32.totalorder %v194_v2, %v1917_v16  ;;  %vm437_vm13 = vcmp.eq.s32.totalorder %v293_v3, %v1917_v16 }
  0xd4   :  { %v221_v1 = vpop.permute.xlu2 %220 }
  0xd5   :  { %v302_v19 = vpop.permute.xlu0 %301  ;;  %v206_v25 = vpop.permute.xlu1 %205 }
  0xd7   :  { %1511 = vmatmul.msk.f32.gmra.mxu0 %vm364_vm14, %v1667_v18  ;;  %1544 = vmatmul.msk.f32.gmra.mxu2 %vm430_vm15, %v1667_v18  ;;  %vm372_vm14 = vcmp.eq.s32.totalorder %v197_v4, %v1905_v12  ;;  %vm438_vm15 = vcmp.eq.s32.totalorder %v296_v5, %v1905_v12 }
  0xd8   :  { %1575 = vmatmul.msk.f32.gmra.mxu1 %vm365_vm0, %v1667_v18  ;;  %1608 = vmatmul.msk.f32.gmra.mxu3 %vm431_vm1, %v1667_v18  ;;  %vm373_vm0 = vcmp.eq.s32.totalorder %v197_v4, %v1917_v16  ;;  %vm439_vm1 = vcmp.eq.s32.totalorder %v296_v5, %v1917_v16 }
  0xdd   :  { %v209_v33 = vpop.permute.xlu0 %208  ;;  %v308_v35 = vpop.permute.xlu1 %307 }
  0xdf   :  { %1512 = vmatmul.msk.f32.gmra.mxu0 %vm366_vm2, %v1667_v18  ;;  %1545 = vmatmul.msk.f32.gmra.mxu2 %vm432_vm3, %v1667_v18  ;;  %vm374_vm2 = vcmp.eq.s32.totalorder %v200_v6, %v1905_v12  ;;  %vm440_vm3 = vcmp.eq.s32.totalorder %v299_v9, %v1905_v12 }
  0xe0   :  { %1576 = vmatmul.msk.f32.gmra.mxu1 %vm367_vm4, %v1667_v18  ;;  %1609 = vmatmul.msk.f32.gmra.mxu3 %vm433_vm5, %v1667_v18  ;;  %vm375_vm4 = vcmp.eq.s32.totalorder %v200_v6, %v1917_v16  ;;  %vm441_vm5 = vcmp.eq.s32.totalorder %v299_v9, %v1917_v16 }
  0xe5   :  { %v311_v43 = vpop.permute.xlu0 %310  ;;  %v215_v49 = vpop.permute.xlu1 %214 }
  0xe7   :  { %1513 = vmatmul.msk.f32.gmra.mxu0 %vm368_vm6, %v1667_v18  ;;  %1546 = vmatmul.msk.f32.gmra.mxu2 %vm434_vm7, %v1667_v18  ;;  %vm376_vm6 = vcmp.eq.s32.totalorder %v203_v15, %v1905_v12  ;;  %vm442_vm7 = vcmp.eq.s32.totalorder %v302_v19, %v1905_v12 }
  0xe8   :  { %1577 = vmatmul.msk.f32.gmra.mxu1 %vm369_vm8, %v1667_v18  ;;  %1610 = vmatmul.msk.f32.gmra.mxu3 %vm435_vm9, %v1667_v18  ;;  %vm377_vm8 = vcmp.eq.s32.totalorder %v203_v15, %v1917_v16  ;;  %vm443_vm9 = vcmp.eq.s32.totalorder %v302_v19, %v1917_v16 }
  0xed   :  { %v218_v57 = vpop.permute.xlu0 %217  ;;  %v317_v59 = vpop.permute.xlu1 %316 }
  0xef   :  { %1514 = vmatmul.msk.f32.gmra.mxu0 %vm370_vm10, %v1667_v18  ;;  %1547 = vmatmul.msk.f32.gmra.mxu2 %vm436_vm11, %v1667_v18  ;;  %vm378_vm10 = vcmp.eq.s32.totalorder %v206_v25, %v1905_v12  ;;  %vm444_vm11 = vcmp.eq.s32.totalorder %v305_v27, %v1905_v12 }
  0xf0   :  { %1578 = vmatmul.msk.f32.gmra.mxu1 %vm371_vm12, %v1667_v18  ;;  %1611 = vmatmul.msk.f32.gmra.mxu3 %vm437_vm13, %v1667_v18  ;;  %vm379_vm12 = vcmp.eq.s32.totalorder %v206_v25, %v1917_v16  ;;  %vm445_vm13 = vcmp.eq.s32.totalorder %v305_v27, %v1917_v16 }
  0xf5   :  { %v320_v3 = vpop.permute.xlu0 %319  ;;  %v224_v9 = vpop.permute.xlu1 %223 }
  0xf7   :  { %1515 = vmatmul.msk.f32.gmra.mxu0 %vm372_vm14, %v1667_v18  ;;  %1548 = vmatmul.msk.f32.gmra.mxu2 %vm438_vm15, %v1667_v18  ;;  %vm380_vm14 = vcmp.eq.s32.totalorder %v209_v33, %v1905_v12  ;;  %vm446_vm15 = vcmp.eq.s32.totalorder %v308_v35, %v1905_v12 }
  0xf8   :  { %1579 = vmatmul.msk.f32.gmra.mxu1 %vm373_vm0, %v1667_v18  ;;  %1612 = vmatmul.msk.f32.gmra.mxu3 %vm439_vm1, %v1667_v18  ;;  %vm381_vm0 = vcmp.eq.s32.totalorder %v209_v33, %v1917_v16  ;;  %vm447_vm1 = vcmp.eq.s32.totalorder %v308_v35, %v1917_v16 }
  0xfa   :  { %v935_v7 = vpop.f32.mrf.mxu2  ;;  %v1144_v8 = vpop.f32.mrf.mxu3 }
  0xfb   :  { %v1145_v10 = vadd.f32 %v1144_v8, %v935_v7 }
  0xfc   :  { %v839_v11 = vpop.f32.mrf.mxu0 }
  0xfd   :  { %v1048_v13 = vpop.f32.mrf.mxu1  ;;  %1336 = vst [vmem:[%s2426_s2 + $0x100] sm:$0xff] %v1145_v10 }
  0xfe   :  { %v1049_v14 = vadd.f32 %v1048_v13, %v839_v11  ;;  %v323_v11 = vpop.permute.xlu2 %322 }
  0xff   :  { %1516 = vmatmul.msk.f32.gmra.mxu0 %vm374_vm2, %v1667_v18  ;;  %1549 = vmatmul.msk.f32.gmra.mxu2 %vm440_vm3, %v1667_v18  ;;  %vm382_vm2 = vcmp.eq.s32.totalorder %v212_v41, %v1905_v12  ;;  %vm448_vm3 = vcmp.eq.s32.totalorder %v311_v43, %v1905_v12 }
 0x100   :  { %1580 = vmatmul.msk.f32.gmra.mxu1 %vm375_vm4, %v1667_v18  ;;  %1613 = vmatmul.msk.f32.gmra.mxu3 %vm441_vm5, %v1667_v18  ;;  %1304 = vst [vmem:[%s2426_s2] sm:$0xff] %v1049_v14  ;;  %vm383_vm4 = vcmp.eq.s32.totalorder %v212_v41, %v1917_v16  ;;  %vm449_vm5 = vcmp.eq.s32.totalorder %v311_v43, %v1917_v16 }
 0x102   :  { %v938_v17 = vpop.f32.mrf.mxu2 }
 0x103   :  { %v1147_v20 = vpop.f32.mrf.mxu3 }
 0x104   :  { %v1148_v21 = vadd.f32 %v1147_v20, %v938_v17  ;;  %v842_v22 = vpop.f32.mrf.mxu0  ;;  %v227_v20 = vpop.permute.xlu0 %226 }
 0x105   :  { %v1051_v23 = vpop.f32.mrf.mxu1 }
 0x106   :  { %v1052_v24 = vadd.f32 %v1051_v23, %v842_v22  ;;  %1337 = vst [vmem:[%s2426_s2 + $0x108] sm:$0xff] %v1148_v21  ;;  %v326_v22 = vpop.permute.xlu1 %325 }
 0x107   :  { %1517 = vmatmul.msk.f32.gmra.mxu0 %vm376_vm6, %v1667_v18  ;;  %1550 = vmatmul.msk.f32.gmra.mxu2 %vm442_vm7, %v1667_v18  ;;  %vm384_vm6 = vcmp.eq.s32.totalorder %v215_v49, %v1905_v12  ;;  %vm450_vm7 = vcmp.eq.s32.totalorder %v314_v51, %v1905_v12 }
 0x108   :  { %1581 = vmatmul.msk.f32.gmra.mxu1 %vm377_vm8, %v1667_v18  ;;  %1614 = vmatmul.msk.f32.gmra.mxu3 %vm443_vm9, %v1667_v18  ;;  %1305 = vst [vmem:[%s2426_s2 + $0x8] sm:$0xff] %v1052_v24  ;;  %vm385_vm8 = vcmp.eq.s32.totalorder %v215_v49, %v1917_v16  ;;  %vm451_vm9 = vcmp.eq.s32.totalorder %v314_v51, %v1917_v16 }
 0x10a   :  { %v941_v26 = vpop.f32.mrf.mxu2 }
 0x10b   :  { %v1150_v28 = vpop.f32.mrf.mxu3 }
 0x10c   :  { %v1151_v29 = vadd.f32 %v1150_v28, %v941_v26  ;;  %v845_v30 = vpop.f32.mrf.mxu0  ;;  %v230_v28 = vpop.permute.xlu2 %229 }
 0x10d   :  { %v1054_v31 = vpop.f32.mrf.mxu1 }
 0x10e   :  { %v1055_v32 = vadd.f32 %v1054_v31, %v845_v30  ;;  %1338 = vst [vmem:[%s2426_s2 + $0x110] sm:$0xff] %v1151_v29  ;;  %v329_v30 = vpop.permute.xlu0 %328 }
 0x10f   :  { %1518 = vmatmul.msk.f32.gmra.mxu0 %vm378_vm10, %v1667_v18  ;;  %1551 = vmatmul.msk.f32.gmra.mxu2 %vm444_vm11, %v1667_v18  ;;  %vm386_vm10 = vcmp.eq.s32.totalorder %v218_v57, %v1905_v12  ;;  %vm452_vm11 = vcmp.eq.s32.totalorder %v317_v59, %v1905_v12 }
 0x110   :  { %1582 = vmatmul.msk.f32.gmra.mxu1 %vm379_vm12, %v1667_v18  ;;  %1615 = vmatmul.msk.f32.gmra.mxu3 %vm445_vm13, %v1667_v18  ;;  %1306 = vst [vmem:[%s2426_s2 + $0x10] sm:$0xff] %v1055_v32  ;;  %vm387_vm12 = vcmp.eq.s32.totalorder %v218_v57, %v1917_v16  ;;  %vm453_vm13 = vcmp.eq.s32.totalorder %v317_v59, %v1917_v16 }
 0x112   :  { %v944_v34 = vpop.f32.mrf.mxu2 }
 0x113   :  { %v1153_v36 = vpop.f32.mrf.mxu3 }
 0x114   :  { %v1154_v37 = vadd.f32 %v1153_v36, %v944_v34  ;;  %v848_v38 = vpop.f32.mrf.mxu0  ;;  %v233_v36 = vpop.permute.xlu1 %232 }
 0x115   :  { %v1057_v39 = vpop.f32.mrf.mxu1 }
 0x116   :  { %v1058_v40 = vadd.f32 %v1057_v39, %v848_v38  ;;  %1339 = vst [vmem:[%s2426_s2 + $0x118] sm:$0xff] %v1154_v37  ;;  %v332_v38 = vpop.permute.xlu2 %331 }
 0x117   :  { %1519 = vmatmul.msk.f32.gmra.mxu0 %vm380_vm14, %v1667_v18  ;;  %1552 = vmatmul.msk.f32.gmra.mxu2 %vm446_vm15, %v1667_v18  ;;  %vm454_vm14 = vcmp.eq.s32.totalorder %v320_v3, %v1905_v12  ;;  %vm388_vm15 = vcmp.eq.s32.totalorder %v221_v1, %v1905_v12 }
 0x118   :  { %1583 = vmatmul.msk.f32.gmra.mxu1 %vm381_vm0, %v1667_v18  ;;  %1616 = vmatmul.msk.f32.gmra.mxu3 %vm447_vm1, %v1667_v18  ;;  %1307 = vst [vmem:[%s2426_s2 + $0x18] sm:$0xff] %v1058_v40  ;;  %vm455_vm0 = vcmp.eq.s32.totalorder %v320_v3, %v1917_v16  ;;  %vm389_vm1 = vcmp.eq.s32.totalorder %v221_v1, %v1917_v16 }
 0x11a   :  { %v947_v42 = vpop.f32.mrf.mxu2 }
 0x11b   :  { %v1156_v44 = vpop.f32.mrf.mxu3 }
 0x11c   :  { %v1157_v45 = vadd.f32 %v1156_v44, %v947_v42  ;;  %v851_v46 = vpop.f32.mrf.mxu0  ;;  %v236_v44 = vpop.permute.xlu0 %235 }
 0x11d   :  { %v1060_v47 = vpop.f32.mrf.mxu1 }
 0x11e   :  { %v1061_v48 = vadd.f32 %v1060_v47, %v851_v46  ;;  %1340 = vst [vmem:[%s2426_s2 + $0x120] sm:$0xff] %v1157_v45  ;;  %v335_v46 = vpop.permute.xlu1 %334 }
 0x11f   :  { %1520 = vmatmul.msk.f32.gmra.mxu0 %vm382_vm2, %v1667_v18  ;;  %1553 = vmatmul.msk.f32.gmra.mxu2 %vm448_vm3, %v1667_v18  ;;  %vm456_vm2 = vcmp.eq.s32.totalorder %v323_v11, %v1905_v12  ;;  %vm390_vm3 = vcmp.eq.s32.totalorder %v224_v9, %v1905_v12 }
 0x120   :  { %1584 = vmatmul.msk.f32.gmra.mxu1 %vm383_vm4, %v1667_v18  ;;  %1617 = vmatmul.msk.f32.gmra.mxu3 %vm449_vm5, %v1667_v18  ;;  %1308 = vst [vmem:[%s2426_s2 + $0x20] sm:$0xff] %v1061_v48  ;;  %vm457_vm4 = vcmp.eq.s32.totalorder %v323_v11, %v1917_v16  ;;  %vm391_vm5 = vcmp.eq.s32.totalorder %v224_v9, %v1917_v16 }
 0x122   :  { %v950_v50 = vpop.f32.mrf.mxu2 }
 0x123   :  { %v1159_v52 = vpop.f32.mrf.mxu3 }
 0x124   :  { %v1160_v53 = vadd.f32 %v1159_v52, %v950_v50  ;;  %v854_v54 = vpop.f32.mrf.mxu0  ;;  %v239_v52 = vpop.permute.xlu2 %238 }
 0x125   :  { %v1063_v55 = vpop.f32.mrf.mxu1 }
 0x126   :  { %v1064_v56 = vadd.f32 %v1063_v55, %v854_v54  ;;  %1341 = vst [vmem:[%s2426_s2 + $0x128] sm:$0xff] %v1160_v53  ;;  %v338_v54 = vpop.permute.xlu0 %337 }
 0x127   :  { %1521 = vmatmul.msk.f32.gmra.mxu0 %vm384_vm6, %v1667_v18  ;;  %1554 = vmatmul.msk.f32.gmra.mxu2 %vm450_vm7, %v1667_v18  ;;  %vm458_vm6 = vcmp.eq.s32.totalorder %v326_v22, %v1905_v12  ;;  %vm392_vm7 = vcmp.eq.s32.totalorder %v227_v20, %v1905_v12 }
 0x128   :  { %1585 = vmatmul.msk.f32.gmra.mxu1 %vm385_vm8, %v1667_v18  ;;  %1618 = vmatmul.msk.f32.gmra.mxu3 %vm451_vm9, %v1667_v18  ;;  %1309 = vst [vmem:[%s2426_s2 + $0x28] sm:$0xff] %v1064_v56  ;;  %vm459_vm8 = vcmp.eq.s32.totalorder %v326_v22, %v1917_v16  ;;  %vm393_vm9 = vcmp.eq.s32.totalorder %v227_v20, %v1917_v16 }
 0x12a   :  { %v953_v58 = vpop.f32.mrf.mxu2 }
 0x12b   :  { %v1162_v60 = vpop.f32.mrf.mxu3 }
 0x12c   :  { %v1163_v61 = vadd.f32 %v1162_v60, %v953_v58  ;;  %v857_v62 = vpop.f32.mrf.mxu0  ;;  %v341_v60 = vpop.permute.xlu2 %340 }
 0x12d   :  { %v1066_v63 = vpop.f32.mrf.mxu1 }
 0x12e   :  { %v1067_v0 = vadd.f32 %v1066_v63, %v857_v62  ;;  %1342 = vst [vmem:[%s2426_s2 + $0x130] sm:$0xff] %v1163_v61  ;;  %v242_v62 = vpop.permute.xlu1 %241 }
 0x12f   :  { %1522 = vmatmul.msk.f32.gmra.mxu0 %vm386_vm10, %v1667_v18  ;;  %1555 = vmatmul.msk.f32.gmra.mxu2 %vm452_vm11, %v1667_v18  ;;  %vm394_vm10 = vcmp.eq.s32.totalorder %v230_v28, %v1905_v12  ;;  %vm460_vm11 = vcmp.eq.s32.totalorder %v329_v30, %v1905_v12 }
 0x130   :  { %1586 = vmatmul.msk.f32.gmra.mxu1 %vm387_vm12, %v1667_v18  ;;  %1619 = vmatmul.msk.f32.gmra.mxu3 %vm453_vm13, %v1667_v18  ;;  %1310 = vst [vmem:[%s2426_s2 + $0x30] sm:$0xff] %v1067_v0  ;;  %vm395_vm12 = vcmp.eq.s32.totalorder %v230_v28, %v1917_v16  ;;  %vm461_vm13 = vcmp.eq.s32.totalorder %v329_v30, %v1917_v16 }
 0x132   :  { %v956_v2 = vpop.f32.mrf.mxu2 }
 0x133   :  { %v1165_v4 = vpop.f32.mrf.mxu3 }
 0x134   :  { %v1166_v5 = vadd.f32 %v1165_v4, %v956_v2  ;;  %v860_v6 = vpop.f32.mrf.mxu0 }
 0x135   :  { %v1069_v7 = vpop.f32.mrf.mxu1 }
 0x136   :  { %v1070_v8 = vadd.f32 %v1069_v7, %v860_v6  ;;  %1343 = vst [vmem:[%s2426_s2 + $0x138] sm:$0xff] %v1166_v5  ;;  %v245_v5 = vpop.permute.xlu0 %244 }
 0x137   :  { %1523 = vmatmul.msk.f32.gmra.mxu0 %vm388_vm15, %v1667_v18  ;;  %1556 = vmatmul.msk.f32.gmra.mxu2 %vm454_vm14, %v1667_v18  ;;  %vm462_vm14 = vcmp.eq.s32.totalorder %v332_v38, %v1905_v12  ;;  %vm396_vm15 = vcmp.eq.s32.totalorder %v233_v36, %v1905_v12 }
 0x138   :  { %1587 = vmatmul.msk.f32.gmra.mxu1 %vm389_vm1, %v1667_v18  ;;  %1620 = vmatmul.msk.f32.gmra.mxu3 %vm455_vm0, %v1667_v18  ;;  %1311 = vst [vmem:[%s2426_s2 + $0x38] sm:$0xff] %v1070_v8  ;;  %vm463_vm0 = vcmp.eq.s32.totalorder %v332_v38, %v1917_v16  ;;  %vm397_vm1 = vcmp.eq.s32.totalorder %v233_v36, %v1917_v16 }
 0x13a   :  { %v959_v10 = vpop.f32.mrf.mxu2 }
 0x13b   :  { %v1168_v13 = vpop.f32.mrf.mxu3 }
 0x13c   :  { %v1169_v14 = vadd.f32 %v1168_v13, %v959_v10  ;;  %v863_v15 = vpop.f32.mrf.mxu0 }
 0x13d   :  { %v1072_v17 = vpop.f32.mrf.mxu1 }
 0x13e   :  { %v1073_v19 = vadd.f32 %v1072_v17, %v863_v15  ;;  %1344 = vst [vmem:[%s2426_s2 + $0x140] sm:$0xff] %v1169_v14 }
 0x13f   :  { %1524 = vmatmul.msk.f32.gmra.mxu0 %vm390_vm3, %v1667_v18  ;;  %1557 = vmatmul.msk.f32.gmra.mxu2 %vm456_vm2, %v1667_v18  ;;  %vm464_vm2 = vcmp.eq.s32.totalorder %v335_v46, %v1905_v12  ;;  %vm398_vm3 = vcmp.eq.s32.totalorder %v236_v44, %v1905_v12 }
 0x140   :  { %1588 = vmatmul.msk.f32.gmra.mxu1 %vm391_vm5, %v1667_v18  ;;  %1621 = vmatmul.msk.f32.gmra.mxu3 %vm457_vm4, %v1667_v18  ;;  %1312 = vst [vmem:[%s2426_s2 + $0x40] sm:$0xff] %v1073_v19  ;;  %vm465_vm4 = vcmp.eq.s32.totalorder %v335_v46, %v1917_v16  ;;  %vm399_vm5 = vcmp.eq.s32.totalorder %v236_v44, %v1917_v16 }
 0x142   :  { %v962_v21 = vpop.f32.mrf.mxu2 }
 0x143   :  { %v1171_v23 = vpop.f32.mrf.mxu3 }
 0x144   :  { %v1172_v24 = vadd.f32 %v1171_v23, %v962_v21  ;;  %v866_v25 = vpop.f32.mrf.mxu0 }
 0x145   :  { %v1075_v26 = vpop.f32.mrf.mxu1 }
 0x146   :  { %v1076_v27 = vadd.f32 %v1075_v26, %v866_v25  ;;  %1345 = vst [vmem:[%s2426_s2 + $0x148] sm:$0xff] %v1172_v24 }
 0x147   :  { %1525 = vmatmul.msk.f32.gmra.mxu0 %vm392_vm7, %v1667_v18  ;;  %1558 = vmatmul.msk.f32.gmra.mxu2 %vm458_vm6, %v1667_v18  ;;  %vm400_vm6 = vcmp.eq.s32.totalorder %v239_v52, %v1905_v12  ;;  %vm466_vm7 = vcmp.eq.s32.totalorder %v338_v54, %v1905_v12 }
 0x148   :  { %1589 = vmatmul.msk.f32.gmra.mxu1 %vm393_vm9, %v1667_v18  ;;  %1622 = vmatmul.msk.f32.gmra.mxu3 %vm459_vm8, %v1667_v18  ;;  %1313 = vst [vmem:[%s2426_s2 + $0x48] sm:$0xff] %v1076_v27  ;;  %vm401_vm8 = vcmp.eq.s32.totalorder %v239_v52, %v1917_v16  ;;  %vm467_vm9 = vcmp.eq.s32.totalorder %v338_v54, %v1917_v16 }
 0x14a   :  { %v965_v29 = vpop.f32.mrf.mxu2 }
 0x14b   :  { %v1174_v31 = vpop.f32.mrf.mxu3 }
 0x14c   :  { %v1175_v32 = vadd.f32 %v1174_v31, %v965_v29  ;;  %v869_v33 = vpop.f32.mrf.mxu0 }
 0x14d   :  { %v1078_v34 = vpop.f32.mrf.mxu1 }
 0x14e   :  { %v1079_v35 = vadd.f32 %v1078_v34, %v869_v33  ;;  %1346 = vst [vmem:[%s2426_s2 + $0x150] sm:$0xff] %v1175_v32 }
 0x14f   :  { %1526 = vmatmul.msk.f32.gmra.mxu0 %vm394_vm10, %v1667_v18  ;;  %1559 = vmatmul.msk.f32.gmra.mxu2 %vm460_vm11, %v1667_v18  ;;  %vm468_vm10 = vcmp.eq.s32.totalorder %v341_v60, %v1905_v12  ;;  %vm402_vm11 = vcmp.eq.s32.totalorder %v242_v62, %v1905_v12 }
 0x150   :  { %1590 = vmatmul.msk.f32.gmra.mxu1 %vm395_vm12, %v1667_v18  ;;  %1623 = vmatmul.msk.f32.gmra.mxu3 %vm461_vm13, %v1667_v18  ;;  %1314 = vst [vmem:[%s2426_s2 + $0x50] sm:$0xff] %v1079_v35  ;;  %vm469_vm12 = vcmp.eq.s32.totalorder %v341_v60, %v1917_v16  ;;  %vm403_vm13 = vcmp.eq.s32.totalorder %v242_v62, %v1917_v16 }
 0x152   :  { %v968_v37 = vpop.f32.mrf.mxu2 }
 0x153   :  { %v1177_v39 = vpop.f32.mrf.mxu3 }
 0x154   :  { %v1178_v40 = vadd.f32 %v1177_v39, %v968_v37  ;;  %v872_v41 = vpop.f32.mrf.mxu0 }
 0x155   :  { %v1081_v42 = vpop.f32.mrf.mxu1 }
 0x156   :  { %v1082_v43 = vadd.f32 %v1081_v42, %v872_v41  ;;  %1347 = vst [vmem:[%s2426_s2 + $0x158] sm:$0xff] %v1178_v40 }
 0x157   :  { %1527 = vmatmul.msk.f32.gmra.mxu0 %vm396_vm15, %v1667_v18  ;;  %1560 = vmatmul.msk.f32.gmra.mxu2 %vm462_vm14, %v1667_v18  ;;  %vm404_vm14 = vcmp.eq.s32.totalorder %v245_v5, %v1905_v12  ;;  %vm405_vm15 = vcmp.eq.s32.totalorder %v245_v5, %v1917_v16 }
 0x158   :  { %1591 = vmatmul.msk.f32.gmra.mxu1 %vm397_vm1, %v1667_v18  ;;  %1624 = vmatmul.msk.f32.gmra.mxu3 %vm463_vm0, %v1667_v18  ;;  %1315 = vst [vmem:[%s2426_s2 + $0x58] sm:$0xff] %v1082_v43 }
 0x15a   :  { %v971_v45 = vpop.f32.mrf.mxu2 }
 0x15b   :  { %v1180_v47 = vpop.f32.mrf.mxu3 }
 0x15c   :  { %v1181_v48 = vadd.f32 %v1180_v47, %v971_v45  ;;  %v875_v49 = vpop.f32.mrf.mxu0 }
 0x15d   :  { %v1084_v50 = vpop.f32.mrf.mxu1 }
 0x15e   :  { %v1085_v51 = vadd.f32 %v1084_v50, %v875_v49  ;;  %1348 = vst [vmem:[%s2426_s2 + $0x160] sm:$0xff] %v1181_v48 }
 0x15f   :  { %1528 = vmatmul.msk.f32.gmra.mxu0 %vm398_vm3, %v1667_v18  ;;  %1561 = vmatmul.msk.f32.gmra.mxu2 %vm464_vm2, %v1667_v18 }
 0x160   :  { %1592 = vmatmul.msk.f32.gmra.mxu1 %vm399_vm5, %v1667_v18  ;;  %1625 = vmatmul.msk.f32.gmra.mxu3 %vm465_vm4, %v1667_v18  ;;  %1316 = vst [vmem:[%s2426_s2 + $0x60] sm:$0xff] %v1085_v51 }
 0x162   :  { %v974_v53 = vpop.f32.mrf.mxu2 }
 0x163   :  { %v1183_v55 = vpop.f32.mrf.mxu3 }
 0x164   :  { %v1184_v56 = vadd.f32 %v1183_v55, %v974_v53  ;;  %v878_v57 = vpop.f32.mrf.mxu0 }
 0x165   :  { %v1087_v58 = vpop.f32.mrf.mxu1 }
 0x166   :  { %v1088_v59 = vadd.f32 %v1087_v58, %v878_v57  ;;  %1349 = vst [vmem:[%s2426_s2 + $0x168] sm:$0xff] %v1184_v56 }
 0x167   :  { %1529 = vmatmul.msk.f32.gmra.mxu0 %vm400_vm6, %v1667_v18  ;;  %1562 = vmatmul.msk.f32.gmra.mxu2 %vm466_vm7, %v1667_v18 }
 0x168   :  { %1593 = vmatmul.msk.f32.gmra.mxu1 %vm401_vm8, %v1667_v18  ;;  %1626 = vmatmul.msk.f32.gmra.mxu3 %vm467_vm9, %v1667_v18  ;;  %1317 = vst [vmem:[%s2426_s2 + $0x68] sm:$0xff] %v1088_v59 }
 0x16a   :  { %v977_v61 = vpop.f32.mrf.mxu2 }
 0x16b   :  { %v1186_v63 = vpop.f32.mrf.mxu3 }
 0x16c   :  { %v1187_v0 = vadd.f32 %v1186_v63, %v977_v61  ;;  %v881_v1 = vpop.f32.mrf.mxu0 }
 0x16d   :  { %v1090_v2 = vpop.f32.mrf.mxu1 }
 0x16e   :  { %v1091_v3 = vadd.f32 %v1090_v2, %v881_v1  ;;  %1350 = vst [vmem:[%s2426_s2 + $0x170] sm:$0xff] %v1187_v0 }
 0x16f   :  { %1530 = vmatmul.msk.f32.gmra.mxu0 %vm402_vm11, %v1667_v18  ;;  %1563 = vmatmul.msk.f32.gmra.mxu2 %vm468_vm10, %v1667_v18 }
 0x170   :  { %1594 = vmatmul.msk.f32.gmra.mxu1 %vm403_vm13, %v1667_v18  ;;  %1627 = vmatmul.msk.f32.gmra.mxu3 %vm469_vm12, %v1667_v18  ;;  %1318 = vst [vmem:[%s2426_s2 + $0x70] sm:$0xff] %v1091_v3 }
 0x172   :  { %v980_v4 = vpop.f32.mrf.mxu2 }
 0x173   :  { %v1189_v6 = vpop.f32.mrf.mxu3 }
 0x174   :  { %v1190_v7 = vadd.f32 %v1189_v6, %v980_v4  ;;  %v884_v8 = vpop.f32.mrf.mxu0 }
 0x175   :  { %v1093_v9 = vpop.f32.mrf.mxu1 }
 0x176   :  { %v1094_v10 = vadd.f32 %v1093_v9, %v884_v8  ;;  %1351 = vst [vmem:[%s2426_s2 + $0x178] sm:$0xff] %v1190_v7 }
 0x177   :  { %1531 = vmatmul.msk.f32.gmra.mxu0 %vm404_vm14, %v1667_v18 }
 0x178   :  { %1595 = vmatmul.msk.f32.gmra.mxu1 %vm405_vm15, %v1667_v18  ;;  %1319 = vst [vmem:[%s2426_s2 + $0x78] sm:$0xff] %v1094_v10 }
 0x17a   :  { %v983_v11 = vpop.f32.mrf.mxu2 }
 0x17b   :  { %v1192_v13 = vpop.f32.mrf.mxu3 }
 0x17c   :  { %v1193_v14 = vadd.f32 %v1192_v13, %v983_v11  ;;  %v887_v15 = vpop.f32.mrf.mxu0 }
 0x17d   :  { %v1096_v12 = vpop.f32.mrf.mxu1 }
 0x17e   :  { %v1097_v17 = vadd.f32 %v1096_v12, %v887_v15  ;;  %1352 = vst [vmem:[%s2426_s2 + $0x180] sm:$0xff] %v1193_v14 }
 0x180   :  { %1320 = vst [vmem:[%s2426_s2 + $0x80] sm:$0xff] %v1097_v17 }
 0x182   :  { %v986_v16 = vpop.f32.mrf.mxu2 }
 0x183   :  { %v1195_v18 = vpop.f32.mrf.mxu3 }
 0x184   :  { %v1196_v19 = vadd.f32 %v1195_v18, %v986_v16  ;;  %v890_v20 = vpop.f32.mrf.mxu0 }
 0x185   :  { %v1099_v21 = vpop.f32.mrf.mxu1 }
 0x186   :  { %v1100_v22 = vadd.f32 %v1099_v21, %v890_v20  ;;  %1353 = vst [vmem:[%s2426_s2 + $0x188] sm:$0xff] %v1196_v19 }
 0x188   :  { %1321 = vst [vmem:[%s2426_s2 + $0x88] sm:$0xff] %v1100_v22 }
 0x18a   :  { %v989_v23 = vpop.f32.mrf.mxu2 }
 0x18b   :  { %v1198_v24 = vpop.f32.mrf.mxu3 }
 0x18c   :  { %v1199_v25 = vadd.f32 %v1198_v24, %v989_v23  ;;  %v893_v26 = vpop.f32.mrf.mxu0 }
 0x18d   :  { %v1102_v27 = vpop.f32.mrf.mxu1 }
 0x18e   :  { %v1103_v28 = vadd.f32 %v1102_v27, %v893_v26  ;;  %1354 = vst [vmem:[%s2426_s2 + $0x190] sm:$0xff] %v1199_v25 }
 0x190   :  { %1322 = vst [vmem:[%s2426_s2 + $0x90] sm:$0xff] %v1103_v28 }
 0x192   :  { %v992_v29 = vpop.f32.mrf.mxu2 }
 0x193   :  { %v1201_v30 = vpop.f32.mrf.mxu3 }
 0x194   :  { %v1202_v31 = vadd.f32 %v1201_v30, %v992_v29  ;;  %v896_v32 = vpop.f32.mrf.mxu0 }
 0x195   :  { %v1105_v33 = vpop.f32.mrf.mxu1 }
 0x196   :  { %v1106_v34 = vadd.f32 %v1105_v33, %v896_v32  ;;  %1355 = vst [vmem:[%s2426_s2 + $0x198] sm:$0xff] %v1202_v31 }
 0x198   :  { %1323 = vst [vmem:[%s2426_s2 + $0x98] sm:$0xff] %v1106_v34 }
 0x19a   :  { %v995_v35 = vpop.f32.mrf.mxu2 }
 0x19b   :  { %v1204_v36 = vpop.f32.mrf.mxu3 }
 0x19c   :  { %v1205_v37 = vadd.f32 %v1204_v36, %v995_v35  ;;  %v899_v38 = vpop.f32.mrf.mxu0 }
 0x19d   :  { %v1108_v39 = vpop.f32.mrf.mxu1 }
 0x19e   :  { %v1109_v40 = vadd.f32 %v1108_v39, %v899_v38  ;;  %1356 = vst [vmem:[%s2426_s2 + $0x1a0] sm:$0xff] %v1205_v37 }
 0x1a0   :  { %1324 = vst [vmem:[%s2426_s2 + $0xa0] sm:$0xff] %v1109_v40 }
 0x1a2   :  { %v998_v41 = vpop.f32.mrf.mxu2 }
 0x1a3   :  { %v1207_v42 = vpop.f32.mrf.mxu3 }
 0x1a4   :  { %v1208_v43 = vadd.f32 %v1207_v42, %v998_v41  ;;  %v902_v44 = vpop.f32.mrf.mxu0 }
 0x1a5   :  { %v1111_v45 = vpop.f32.mrf.mxu1 }
 0x1a6   :  { %v1112_v46 = vadd.f32 %v1111_v45, %v902_v44  ;;  %1357 = vst [vmem:[%s2426_s2 + $0x1a8] sm:$0xff] %v1208_v43 }
 0x1a8   :  { %1325 = vst [vmem:[%s2426_s2 + $0xa8] sm:$0xff] %v1112_v46 }
 0x1aa   :  { %v1001_v47 = vpop.f32.mrf.mxu2 }
 0x1ab   :  { %v1210_v48 = vpop.f32.mrf.mxu3 }
 0x1ac   :  { %v1211_v49 = vadd.f32 %v1210_v48, %v1001_v47  ;;  %v905_v50 = vpop.f32.mrf.mxu0 }
 0x1ad   :  { %v1114_v51 = vpop.f32.mrf.mxu1 }
 0x1ae   :  { %v1115_v52 = vadd.f32 %v1114_v51, %v905_v50  ;;  %1358 = vst [vmem:[%s2426_s2 + $0x1b0] sm:$0xff] %v1211_v49 }
 0x1b0   :  { %1326 = vst [vmem:[%s2426_s2 + $0xb0] sm:$0xff] %v1115_v52 }
 0x1b2   :  { %v1004_v53 = vpop.f32.mrf.mxu2 }
 0x1b3   :  { %v1213_v54 = vpop.f32.mrf.mxu3 }
 0x1b4   :  { %v1214_v55 = vadd.f32 %v1213_v54, %v1004_v53  ;;  %v908_v56 = vpop.f32.mrf.mxu0 }
 0x1b5   :  { %v1117_v57 = vpop.f32.mrf.mxu1 }
 0x1b6   :  { %v1118_v58 = vadd.f32 %v1117_v57, %v908_v56  ;;  %1359 = vst [vmem:[%s2426_s2 + $0x1b8] sm:$0xff] %v1214_v55 }
 0x1b8   :  { %1327 = vst [vmem:[%s2426_s2 + $0xb8] sm:$0xff] %v1118_v58 }
 0x1ba   :  { %v1007_v59 = vpop.f32.mrf.mxu2 }
 0x1bb   :  { %v1216_v60 = vpop.f32.mrf.mxu3 }
 0x1bc   :  { %v1217_v61 = vadd.f32 %v1216_v60, %v1007_v59  ;;  %v911_v62 = vpop.f32.mrf.mxu0 }
 0x1bd   :  { %v1120_v63 = vpop.f32.mrf.mxu1 }
 0x1be   :  { %v1121_v0 = vadd.f32 %v1120_v63, %v911_v62  ;;  %1360 = vst [vmem:[%s2426_s2 + $0x1c0] sm:$0xff] %v1217_v61 }
 0x1c0   :  { %1328 = vst [vmem:[%s2426_s2 + $0xc0] sm:$0xff] %v1121_v0 }
 0x1c2   :  { %v1010_v1 = vpop.f32.mrf.mxu2 }
 0x1c3   :  { %v1219_v2 = vpop.f32.mrf.mxu3 }
 0x1c4   :  { %v1220_v3 = vadd.f32 %v1219_v2, %v1010_v1  ;;  %v914_v4 = vpop.f32.mrf.mxu0 }
 0x1c5   :  { %v1123_v5 = vpop.f32.mrf.mxu1 }
 0x1c6   :  { %v1124_v6 = vadd.f32 %v1123_v5, %v914_v4  ;;  %1361 = vst [vmem:[%s2426_s2 + $0x1c8] sm:$0xff] %v1220_v3 }
 0x1c8   :  { %1329 = vst [vmem:[%s2426_s2 + $0xc8] sm:$0xff] %v1124_v6 }
 0x1ca   :  { %v1013_v7 = vpop.f32.mrf.mxu2 }
 0x1cb   :  { %v1222_v8 = vpop.f32.mrf.mxu3 }
 0x1cc   :  { %v1223_v9 = vadd.f32 %v1222_v8, %v1013_v7  ;;  %v917_v10 = vpop.f32.mrf.mxu0 }
 0x1cd   :  { %v1126_v11 = vpop.f32.mrf.mxu1 }
 0x1ce   :  { %v1127_v13 = vadd.f32 %v1126_v11, %v917_v10  ;;  %1362 = vst [vmem:[%s2426_s2 + $0x1d0] sm:$0xff] %v1223_v9 }
 0x1d0   :  { %1330 = vst [vmem:[%s2426_s2 + $0xd0] sm:$0xff] %v1127_v13 }
 0x1d2   :  { %v1016_v14 = vpop.f32.mrf.mxu2 }
 0x1d3   :  { %v1225_v15 = vpop.f32.mrf.mxu3 }
 0x1d4   :  { %v1226_v12 = vadd.f32 %v1225_v15, %v1016_v14  ;;  %v920_v17 = vpop.f32.mrf.mxu0 }
 0x1d5   :  { %v1129_v16 = vpop.f32.mrf.mxu1 }
 0x1d6   :  { %v1130_v18 = vadd.f32 %v1129_v16, %v920_v17  ;;  %1363 = vst [vmem:[%s2426_s2 + $0x1d8] sm:$0xff] %v1226_v12 }
 0x1d8   :  { %1331 = vst [vmem:[%s2426_s2 + $0xd8] sm:$0xff] %v1130_v18 }
 0x1da   :  { %v1019_v19 = vpop.f32.mrf.mxu2 }
 0x1db   :  { %v1228_v20 = vpop.f32.mrf.mxu3 }
 0x1dc   :  { %v1229_v21 = vadd.f32 %v1228_v20, %v1019_v19  ;;  %v923_v22 = vpop.f32.mrf.mxu0 }
 0x1dd   :  { %v1132_v23 = vpop.f32.mrf.mxu1 }
 0x1de   :  { %v1133_v24 = vadd.f32 %v1132_v23, %v923_v22  ;;  %1364 = vst [vmem:[%s2426_s2 + $0x1e0] sm:$0xff] %v1229_v21 }
 0x1e0   :  { %1332 = vst [vmem:[%s2426_s2 + $0xe0] sm:$0xff] %v1133_v24 }
 0x1e2   :  { %v1022_v25 = vpop.f32.mrf.mxu2 }
 0x1e3   :  { %v1231_v26 = vpop.f32.mrf.mxu3 }
 0x1e4   :  { %v1232_v27 = vadd.f32 %v1231_v26, %v1022_v25  ;;  %v926_v28 = vpop.f32.mrf.mxu0 }
 0x1e5   :  { %v1135_v29 = vpop.f32.mrf.mxu1 }
 0x1e6   :  { %v1136_v30 = vadd.f32 %v1135_v29, %v926_v28  ;;  %1365 = vst [vmem:[%s2426_s2 + $0x1e8] sm:$0xff] %v1232_v27 }
 0x1e8   :  { %1333 = vst [vmem:[%s2426_s2 + $0xe8] sm:$0xff] %v1136_v30 }
 0x1ea   :  { %v1025_v31 = vpop.f32.mrf.mxu2 }
 0x1eb   :  { %v1234_v32 = vpop.f32.mrf.mxu3 }
 0x1ec   :  { %v1235_v33 = vadd.f32 %v1234_v32, %v1025_v31  ;;  %v929_v34 = vpop.f32.mrf.mxu0 }
 0x1ed   :  { %v1138_v35 = vpop.f32.mrf.mxu1 }
 0x1ee   :  { %v1139_v36 = vadd.f32 %v1138_v35, %v929_v34  ;;  %1366 = vst [vmem:[%s2426_s2 + $0x1f0] sm:$0xff] %v1235_v33 }
 0x1f0   :  { %1334 = vst [vmem:[%s2426_s2 + $0xf0] sm:$0xff] %v1139_v36 }
 0x1f2   :  { %v1028_v37 = vpop.f32.mrf.mxu2 }
 0x1f3   :  { %v1237_v38 = vpop.f32.mrf.mxu3 }
 0x1f4   :  { %v1238_v39 = vadd.f32 %v1237_v38, %v1028_v37  ;;  %v932_v40 = vpop.f32.mrf.mxu0 }
 0x1f5   :  { %v1141_v41 = vpop.f32.mrf.mxu1 }
 0x1f6   :  { %v1142_v42 = vadd.f32 %v1141_v41, %v932_v40  ;;  %1367 = vst [vmem:[%s2426_s2 + $0x1f8] sm:$0xff] %v1238_v39 }
 0x1f8   :  { %1335 = vst [vmem:[%s2426_s2 + $0xf8] sm:$0xff] %v1142_v42 }

</bundles_post_ra>
